<compile_context>
chip_gen: v5e
topology: v5e:2x2
jax: 0.10.0
libtpu: 0.0.40
codegen_flags: <defaults>
</compile_context>

<pallas_src>
import functools
import math

import jax
import jax.numpy as jnp
from jax.experimental import pallas as pl
from jax.experimental.pallas import tpu as pltpu


def _fused_mlp_kernel(tok_ref, posc_ref, w1t_ref, w2_ref, b2_ref,
                      w3_ref, b3_ref, out_ref, *, precision):
    # tok_ref : (tile_t, E)   token embeddings for one (t-tile, batch) block
    # posc_ref: (tile_t, 2E)  pos_emb @ W1_pos + b1 (f32), reused across batch
    tok = tok_ref[...].astype(w1t_ref.dtype)

    # Layer 1: concat([pos, tok]) @ W1 + b1
    #        == (pos @ W1_pos + b1) + tok @ W1_tok   (position part hoisted)
    h1 = jnp.dot(tok, w1t_ref[...],
                 preferred_element_type=jnp.float32, precision=precision)
    h1 = jnp.maximum(h1 + posc_ref[...], 0.0)

    # Layer 2: Linear(2E -> 4E) + ReLU
    h2 = jnp.dot(h1.astype(w2_ref.dtype), w2_ref[...],
                 preferred_element_type=jnp.float32, precision=precision)
    h2 = jnp.maximum(h2 + b2_ref[...], 0.0)

    # Layer 3: Linear(4E -> E)
    out = jnp.dot(h2.astype(w3_ref.dtype), w3_ref[...],
                  preferred_element_type=jnp.float32, precision=precision)
    out_ref[...] = (out + b3_ref[...]).astype(out_ref.dtype)


def _largest_tile_dividing(T, pref):
    """Largest multiple of 8 <= pref that divides T, or None."""
    d = (pref // 8) * 8
    while d >= 8:
        if T % d == 0:
            return d
        d -= 8
    return None


def _vmem_need_bytes(tile, E, mm_bytes, tok_bytes, out_bytes):
    weights = (E * 2 * E + 2 * E * 4 * E + 4 * E * E) * mm_bytes + (4 * E + E) * 4
    streams = 2 * tile * (E * tok_bytes + 2 * E * 4 + E * out_bytes)  # dbl-buf
    acts = tile * (2 * E + 4 * E) * 4                                 # h1, h2 f32
    return weights + streams + acts


def integer_position_encoding(tok_emb, params, *,
                              matmul_dtype=jnp.bfloat16, tile_t=1024):
    """Fused integer-position encoding: MLP(concat(pos_emb, tok_emb))."""
    B, T, E = tok_emb.shape
    out_dtype = tok_emb.dtype
    f32 = jnp.float32
    block_size = params["embedding"].shape[0]
    if T > block_size:
        raise ValueError(f"seq_len {T} exceeds block_size {block_size}")

    # --- wrapper-side hoisting (cheap, grid-invariant) ------------------------
    w1 = params["w1"].astype(f32)
    b1 = params["b1"].astype(f32)
    w1_pos, w1_tok = w1[:E, :], w1[E:, :]
    pos_contrib = params["embedding"][:T].astype(f32) @ w1_pos + b1   # (T, 2E)

    w1t = w1_tok.astype(matmul_dtype)                                 # (E, 2E)
    w2 = params["w2"].astype(matmul_dtype)                            # (2E, 4E)
    b2 = params["b2"].astype(f32)                                     # (1, 4E)
    w3 = params["w3"].astype(matmul_dtype)                            # (4E, E)
    b3 = params["b3"].astype(f32)                                     # (1, E)

    mm_bytes = jnp.dtype(matmul_dtype).itemsize
    tok_bytes = jnp.dtype(tok_emb.dtype).itemsize
    out_bytes = jnp.dtype(out_dtype).itemsize

    # --- T-tile selection ------------------------------------------------------
    pref = max(8, (int(tile_t) // 8) * 8)
    if T <= pref:
        tile = T
    else:
        tile = _largest_tile_dividing(T, pref) or pref

    # Honest per-step VMEM accounting against the chip's capacity.
    try:
        vmem_cap = int(pltpu.get_tpu_info().vmem_capacity_bytes)
    except Exception:                       # conservative default (v7x per-TC)
        vmem_cap = 64 * 1024 * 1024
    budget = max(24 * 1024 * 1024, vmem_cap - 12 * 1024 * 1024)
    while tile > 8 and _vmem_need_bytes(tile, E, mm_bytes, tok_bytes,
                                        out_bytes) > budget:
        tile = max(8, ((tile // 2) + 7) // 8 * 8)

    # Give a two-TensorCore part >= 2 grid steps when there is real work.
    if B == 1 and tile >= T and T >= 16:
        tile = min(tile, ((T + 1) // 2 + 7) // 8 * 8)

    nt = pl.cdiv(T, tile)
    T_pad = nt * tile

    tok = tok_emb
    posc = pos_contrib
    if T_pad != T:                          # ragged-remainder fallback only
        tok = jnp.pad(tok, ((0, 0), (0, T_pad - T), (0, 0)))
        posc = jnp.pad(posc, ((0, T_pad - T), (0, 0)))

    kernel = functools.partial(
        _fused_mlp_kernel,
        precision=(jax.lax.Precision.HIGHEST
                   if matmul_dtype == jnp.float32 else None))

    def build_in_specs(single_buffer_weights):
        if single_buffer_weights:
            def wspec(shape):
                return pl.BlockSpec(shape, lambda t, b: (0,) * len(shape),
                                    pipeline_mode=pl.Buffered(1))
        else:
            def wspec(shape):
                return pl.BlockSpec(shape, lambda t, b: (0,) * len(shape))
        return [
            pl.BlockSpec((None, tile, E), lambda t, b: (b, t, 0)),   # tok rows
            pl.BlockSpec((tile, 2 * E), lambda t, b: (t, 0)),        # pos contrib
            wspec((E, 2 * E)),                                        # W1_tok
            wspec((2 * E, 4 * E)),                                    # W2
            wspec((1, 4 * E)),                                        # b2
            wspec((4 * E, E)),                                        # W3
            wspec((1, E)),                                            # b3
        ]

    flops = 2 * B * T_pad * (E * 2 * E + 2 * E * 4 * E + 4 * E * E)
    bytes_accessed = (B * T_pad * E * (tok_bytes + out_bytes)
                      + T_pad * 2 * E * 4
                      + (E * 2 * E + 2 * E * 4 * E + 4 * E * E) * mm_bytes
                      + (4 * E + E) * 4)
    vmem_cap_limit = min(100 * 1024 * 1024, vmem_cap - 4 * 1024 * 1024)
    vmem_limit = int(min(vmem_cap_limit,
                         max(32 * 1024 * 1024,
                             _vmem_need_bytes(tile, E, mm_bytes, tok_bytes,
                                              out_bytes) + (8 << 20))))

    out_pad = None
    err = None
    for single_buffer_weights in (True, False):
        try:
            out_pad = pl.pallas_call(
                kernel,
                out_shape=jax.ShapeDtypeStruct((B, T_pad, E), out_dtype),
                grid_spec=pltpu.PrefetchScalarGridSpec(
                    num_scalar_prefetch=0,
                    grid=(nt, B),
                    in_specs=build_in_specs(single_buffer_weights),
                    out_specs=pl.BlockSpec((None, tile, E),
                                           lambda t, b: (b, t, 0)),
                ),
                compiler_params=pltpu.CompilerParams(
                    dimension_semantics=("parallel", "parallel"),
                    vmem_limit_bytes=vmem_limit),
                cost_estimate=pl.CostEstimate(flops=int(flops),
                                              transcendentals=0,
                                              bytes_accessed=int(bytes_accessed)),
            )(tok, posc, w1t, w2, b2, w3, b3)
            break
        except Exception as e:        # pl.Buffered(1) unsupported -> default buffering
            err = e
    if out_pad is None:
        raise err

    if T_pad != T:
        out_pad = out_pad[:, :T, :]
    return out_pad


def init_params(key, block_size, embedding_dim):
    """Deterministic parameter init mirroring the PyTorch module's shapes."""
    E = embedding_dim
    keys = jax.random.split(key, 7)

    # nn.Embedding(block_size, E, padding_idx=0): N(0,1), row 0 zeroed.
    emb = jax.random.normal(keys[0], (block_size, E), jnp.float32)
    emb = emb.at[0].set(0.0)

    def linear(kw, kb, fan_in, fan_out):
        bound = 1.0 / math.sqrt(fan_in)
        w = jax.random.uniform(kw, (fan_in, fan_out), jnp.float32, -bound, bound)
        b = jax.random.uniform(kb, (1, fan_out), jnp.float32, -bound, bound)
        return w, b

    # mlp_layer_factors = [2, 4, 1], in_factor starts at 2.
    w1, b1 = linear(keys[1], keys[2], 2 * E, 2 * E)
    w2, b2 = linear(keys[3], keys[4], 2 * E, 4 * E)
    w3, b3 = linear(keys[5], keys[6], 4 * E, 1 * E)

    return {"embedding": emb, "w1": w1, "b1": b1,
            "w2": w2, "b2": b2, "w3": w3, "b3": b3}


def reference(tok_emb, params):
    B, T, E = tok_emb.shape
    pos_emb = jnp.broadcast_to(params["embedding"][:T][None], (B, T, E))
    x = jnp.concatenate([pos_emb, tok_emb], axis=-1)
    h1 = jnp.maximum(x @ params["w1"] + params["b1"], 0.0)
    h2 = jnp.maximum(h1 @ params["w2"] + params["b2"], 0.0)
    return h2 @ params["w3"] + params["b3"]


if __name__ == "__main__":
    key = jax.random.PRNGKey(0)
    k_tok, k_params, k_tok2, k_params2 = jax.random.split(key, 4)

    # --- primary small config -------------------------------------------------
    B, T, E = 2, 8, 32
    block_size = 64
    tok_emb = jax.random.normal(k_tok, (B, T, E), jnp.float32)
    params = init_params(k_params, block_size, E)
    ref = reference(tok_emb, params)

    # f32 matmul path (precision=HIGHEST): tight check against the reference.
    out_f32 = jax.block_until_ready(
        integer_position_encoding(tok_emb, params, matmul_dtype=jnp.float32))
    assert out_f32.shape == (B, T, E)
    assert jnp.allclose(out_f32, ref, atol=1e-4, rtol=1e-4), "f32 mismatch"

    # Default bf16-fed-MXU path (f32 accumulation): looser tolerance.
    out_bf16 = jax.block_until_ready(integer_position_encoding(tok_emb, params))
    assert out_bf16.shape == (B, T, E)
    assert jnp.allclose(out_bf16, ref, atol=5e-2, rtol=5e-2), "bf16 mismatch"

    # --- multi-T-tile + ragged-remainder path ---------------------------------
    # tile_t=16 with T=20 -> 2 T-tiles, padded to 32; posc tile reused over B.
    B2, T2 = 3, 20
    tok_emb2 = jax.random.normal(k_tok2, (B2, T2, E), jnp.float32)
    params2 = init_params(k_params2, block_size, E)
    ref2 = reference(tok_emb2, params2)
    out2 = jax.block_until_ready(
        integer_position_encoding(tok_emb2, params2,
                                  matmul_dtype=jnp.float32, tile_t=16))
    assert out2.shape == (B2, T2, E)
    assert jnp.allclose(out2, ref2, atol=1e-4, rtol=1e-4), "tiled f32 mismatch"

    print("KERNEL_OK")
</pallas_src>

<mosaic_0001>
module attributes {stable_mosaic.version = 11 : i64} {
  func.func @_fused_mlp_kernel(%arg0: i32, %arg1: i32, %arg2: memref<1x8x32xf32, #tpu.memory_space<vmem>>, %arg3: memref<8x64xf32, #tpu.memory_space<vmem>>, %arg4: memref<32x64xf32, #tpu.memory_space<vmem>>, %arg5: memref<64x128xf32, #tpu.memory_space<vmem>>, %arg6: memref<1x128xf32, #tpu.memory_space<vmem>>, %arg7: memref<128x32xf32, #tpu.memory_space<vmem>>, %arg8: memref<1x32xf32, #tpu.memory_space<vmem>>, %arg9: memref<1x8x32xf32, #tpu.memory_space<vmem>>) attributes {dimension_semantics = [#tpu.dimension_semantics<parallel>, #tpu.dimension_semantics<parallel>], iteration_bounds = array<i64: 1, 2>, scalar_prefetch = 0 : i64, scratch_operands = 0 : i64, tpu.core_type = #tpu.core_type<tc>, window_params = [{transform_indices = @transform_0, window_bounds = array<i64: 1, 8, 32>}, {transform_indices = @transform_1, window_bounds = array<i64: 8, 64>}, {pipeline_mode = #tpu.pipeline_mode<synchronous>, transform_indices = @transform_2, window_bounds = array<i64: 32, 64>}, {pipeline_mode = #tpu.pipeline_mode<synchronous>, transform_indices = @transform_3, window_bounds = array<i64: 64, 128>}, {pipeline_mode = #tpu.pipeline_mode<synchronous>, transform_indices = @transform_4, window_bounds = array<i64: 1, 128>}, {pipeline_mode = #tpu.pipeline_mode<synchronous>, transform_indices = @transform_5, window_bounds = array<i64: 128, 32>}, {pipeline_mode = #tpu.pipeline_mode<synchronous>, transform_indices = @transform_6, window_bounds = array<i64: 1, 32>}, {transform_indices = @transform_7, window_bounds = array<i64: 1, 8, 32>}]} {
    %c0 = arith.constant 0 : index
    %c0_0 = arith.constant 0 : index
    %c0_1 = arith.constant 0 : index
    %0 = vector.load %arg2[%c0, %c0_0, %c0_1] : memref<1x8x32xf32, #tpu.memory_space<vmem>>, vector<1x8x32xf32>
    %1 = vector.shape_cast %0 : vector<1x8x32xf32> to vector<8x32xf32>
    %c0_2 = arith.constant 0 : index
    %c0_3 = arith.constant 0 : index
    %2 = vector.load %arg4[%c0_2, %c0_3] : memref<32x64xf32, #tpu.memory_space<vmem>>, vector<32x64xf32>
    %cst = arith.constant dense<0.000000e+00> : vector<8x64xf32>
    %3 = tpu.matmul %1, %2, %cst {dimension_numbers = #tpu.dot_dimension_numbers<[1], [0], [0], [1], [0, 0, 1, 1], [], []>, precision = #tpu.contract_precision<fp32>} : vector<8x32xf32>, vector<32x64xf32>, vector<8x64xf32> -> vector<8x64xf32>
    %c0_4 = arith.constant 0 : index
    %c0_5 = arith.constant 0 : index
    %4 = vector.load %arg3[%c0_4, %c0_5] : memref<8x64xf32, #tpu.memory_space<vmem>>, vector<8x64xf32>
    %5 = arith.addf %3, %4 : vector<8x64xf32>
    %cst_6 = arith.constant 0.000000e+00 : f32
    %6 = vector.broadcast %cst_6 : f32 to vector<8x64xf32>
    %7 = arith.maximumf %5, %6 : vector<8x64xf32>
    %c0_7 = arith.constant 0 : index
    %c0_8 = arith.constant 0 : index
    %8 = vector.load %arg5[%c0_7, %c0_8] : memref<64x128xf32, #tpu.memory_space<vmem>>, vector<64x128xf32>
    %cst_9 = arith.constant dense<0.000000e+00> : vector<8x128xf32>
    %9 = tpu.matmul %7, %8, %cst_9 {dimension_numbers = #tpu.dot_dimension_numbers<[1], [0], [0], [1], [0, 0, 1, 1], [], []>, precision = #tpu.contract_precision<fp32>} : vector<8x64xf32>, vector<64x128xf32>, vector<8x128xf32> -> vector<8x128xf32>
    %c0_10 = arith.constant 0 : index
    %c0_11 = arith.constant 0 : index
    %10 = vector.load %arg6[%c0_10, %c0_11] : memref<1x128xf32, #tpu.memory_space<vmem>>, vector<1x128xf32>
    %11 = vector.broadcast %10 : vector<1x128xf32> to vector<8x128xf32>
    %12 = arith.addf %9, %11 : vector<8x128xf32>
    %cst_12 = arith.constant 0.000000e+00 : f32
    %13 = vector.broadcast %cst_12 : f32 to vector<8x128xf32>
    %14 = arith.maximumf %12, %13 : vector<8x128xf32>
    %c0_13 = arith.constant 0 : index
    %c0_14 = arith.constant 0 : index
    %15 = vector.load %arg7[%c0_13, %c0_14] : memref<128x32xf32, #tpu.memory_space<vmem>>, vector<128x32xf32>
    %cst_15 = arith.constant dense<0.000000e+00> : vector<8x32xf32>
    %16 = tpu.matmul %14, %15, %cst_15 {dimension_numbers = #tpu.dot_dimension_numbers<[1], [0], [0], [1], [0, 0, 1, 1], [], []>, precision = #tpu.contract_precision<fp32>} : vector<8x128xf32>, vector<128x32xf32>, vector<8x32xf32> -> vector<8x32xf32>
    %c0_16 = arith.constant 0 : index
    %c0_17 = arith.constant 0 : index
    %17 = vector.load %arg8[%c0_16, %c0_17] : memref<1x32xf32, #tpu.memory_space<vmem>>, vector<1x32xf32>
    %18 = vector.broadcast %17 : vector<1x32xf32> to vector<8x32xf32>
    %19 = arith.addf %16, %18 : vector<8x32xf32>
    %c0_18 = arith.constant 0 : index
    %c0_19 = arith.constant 0 : index
    %c0_20 = arith.constant 0 : index
    %20 = vector.load %arg9[%c0_18, %c0_19, %c0_20] : memref<1x8x32xf32, #tpu.memory_space<vmem>>, vector<1x8x32xf32>
    %21 = vector.shape_cast %20 : vector<1x8x32xf32> to vector<8x32xf32>
    %22 = vector.shape_cast %19 : vector<8x32xf32> to vector<1x8x32xf32>
    tpu.vector_store %arg9[%c0_18, %c0_19, %c0_20], %22 {strides = array<i32>} : memref<1x8x32xf32, #tpu.memory_space<vmem>>, vector<1x8x32xf32>,
    return
  }
  func.func @transform_0(%arg0: i32, %arg1: i32) -> (i32, i32, i32) {
    %c0_i32 = arith.constant 0 : i32
    %c0_i32_0 = arith.constant 0 : i32
    return %arg1, %arg0, %c0_i32 : i32, i32, i32
  }
  func.func @transform_1(%arg0: i32, %arg1: i32) -> (i32, i32) {
    %c0_i32 = arith.constant 0 : i32
    %c0_i32_0 = arith.constant 0 : i32
    return %arg0, %c0_i32 : i32, i32
  }
  func.func @transform_2(%arg0: i32, %arg1: i32) -> (i32, i32) {
    %c0_i32 = arith.constant 0 : i32
    %c0_i32_0 = arith.constant 0 : i32
    %c0_i32_1 = arith.constant 0 : i32
    return %c0_i32, %c0_i32_0 : i32, i32
  }
  func.func @transform_3(%arg0: i32, %arg1: i32) -> (i32, i32) {
    %c0_i32 = arith.constant 0 : i32
    %c0_i32_0 = arith.constant 0 : i32
    %c0_i32_1 = arith.constant 0 : i32
    return %c0_i32, %c0_i32_0 : i32, i32
  }
  func.func @transform_4(%arg0: i32, %arg1: i32) -> (i32, i32) {
    %c0_i32 = arith.constant 0 : i32
    %c0_i32_0 = arith.constant 0 : i32
    %c0_i32_1 = arith.constant 0 : i32
    return %c0_i32, %c0_i32_0 : i32, i32
  }
  func.func @transform_5(%arg0: i32, %arg1: i32) -> (i32, i32) {
    %c0_i32 = arith.constant 0 : i32
    %c0_i32_0 = arith.constant 0 : i32
    %c0_i32_1 = arith.constant 0 : i32
    return %c0_i32, %c0_i32_0 : i32, i32
  }
  func.func @transform_6(%arg0: i32, %arg1: i32) -> (i32, i32) {
    %c0_i32 = arith.constant 0 : i32
    %c0_i32_0 = arith.constant 0 : i32
    %c0_i32_1 = arith.constant 0 : i32
    return %c0_i32, %c0_i32_0 : i32, i32
  }
  func.func @transform_7(%arg0: i32, %arg1: i32) -> (i32, i32, i32) {
    %c0_i32 = arith.constant 0 : i32
    %c0_i32_0 = arith.constant 0 : i32
    return %arg1, %arg0, %c0_i32 : i32, i32, i32
  }
}

module attributes {stable_mosaic.version = 11 : i64} {
  func.func @_fused_mlp_kernel(%arg0: i32, %arg1: i32, %arg2: memref<1x8x32xf32, #tpu.memory_space<vmem>>, %arg3: memref<8x64xf32, #tpu.memory_space<vmem>>, %arg4: memref<32x64xf32, #tpu.memory_space<vmem>>, %arg5: memref<64x128xf32, #tpu.memory_space<vmem>>, %arg6: memref<1x128xf32, #tpu.memory_space<vmem>>, %arg7: memref<128x32xf32, #tpu.memory_space<vmem>>, %arg8: memref<1x32xf32, #tpu.memory_space<vmem>>, %arg9: memref<1x8x32xf32, #tpu.memory_space<vmem>>) attributes {dimension_semantics = [#tpu.dimension_semantics<parallel>, #tpu.dimension_semantics<parallel>], iteration_bounds = array<i64: 1, 2>, scalar_prefetch = 0 : i64, scratch_operands = 0 : i64, tpu.core_type = #tpu.core_type<tc>, window_params = [{transform_indices = @transform_0, window_bounds = array<i64: 1, 8, 32>}, {transform_indices = @transform_1, window_bounds = array<i64: 8, 64>}, {pipeline_mode = #tpu.pipeline_mode<synchronous>, transform_indices = @transform_2, window_bounds = array<i64: 32, 64>}, {pipeline_mode = #tpu.pipeline_mode<synchronous>, transform_indices = @transform_3, window_bounds = array<i64: 64, 128>}, {pipeline_mode = #tpu.pipeline_mode<synchronous>, transform_indices = @transform_4, window_bounds = array<i64: 1, 128>}, {pipeline_mode = #tpu.pipeline_mode<synchronous>, transform_indices = @transform_5, window_bounds = array<i64: 128, 32>}, {pipeline_mode = #tpu.pipeline_mode<synchronous>, transform_indices = @transform_6, window_bounds = array<i64: 1, 32>}, {transform_indices = @transform_7, window_bounds = array<i64: 1, 8, 32>}]} {
    %c0 = arith.constant 0 : index
    %c0_0 = arith.constant 0 : index
    %c0_1 = arith.constant 0 : index
    %0 = vector.load %arg2[%c0, %c0_0, %c0_1] : memref<1x8x32xf32, #tpu.memory_space<vmem>>, vector<1x8x32xf32>
    %1 = vector.shape_cast %0 : vector<1x8x32xf32> to vector<8x32xf32>
    %c0_2 = arith.constant 0 : index
    %c0_3 = arith.constant 0 : index
    %2 = vector.load %arg4[%c0_2, %c0_3] : memref<32x64xf32, #tpu.memory_space<vmem>>, vector<32x64xf32>
    %cst = arith.constant dense<0.000000e+00> : vector<8x64xf32>
    %3 = tpu.matmul %1, %2, %cst {dimension_numbers = #tpu.dot_dimension_numbers<[1], [0], [0], [1], [0, 0, 1, 1], [], []>, precision = #tpu.contract_precision<fp32>} : vector<8x32xf32>, vector<32x64xf32>, vector<8x64xf32> -> vector<8x64xf32>
    %c0_4 = arith.constant 0 : index
    %c0_5 = arith.constant 0 : index
    %4 = vector.load %arg3[%c0_4, %c0_5] : memref<8x64xf32, #tpu.memory_space<vmem>>, vector<8x64xf32>
    %5 = arith.addf %3, %4 : vector<8x64xf32>
    %cst_6 = arith.constant 0.000000e+00 : f32
    %6 = vector.broadcast %cst_6 : f32 to vector<8x64xf32>
    %7 = arith.maximumf %5, %6 : vector<8x64xf32>
    %c0_7 = arith.constant 0 : index
    %c0_8 = arith.constant 0 : index
    %8 = vector.load %arg5[%c0_7, %c0_8] : memref<64x128xf32, #tpu.memory_space<vmem>>, vector<64x128xf32>
    %cst_9 = arith.constant dense<0.000000e+00> : vector<8x128xf32>
    %9 = tpu.matmul %7, %8, %cst_9 {dimension_numbers = #tpu.dot_dimension_numbers<[1], [0], [0], [1], [0, 0, 1, 1], [], []>, precision = #tpu.contract_precision<fp32>} : vector<8x64xf32>, vector<64x128xf32>, vector<8x128xf32> -> vector<8x128xf32>
    %c0_10 = arith.constant 0 : index
    %c0_11 = arith.constant 0 : index
    %10 = vector.load %arg6[%c0_10, %c0_11] : memref<1x128xf32, #tpu.memory_space<vmem>>, vector<1x128xf32>
    %11 = vector.broadcast %10 : vector<1x128xf32> to vector<8x128xf32>
    %12 = arith.addf %9, %11 : vector<8x128xf32>
    %cst_12 = arith.constant 0.000000e+00 : f32
    %13 = vector.broadcast %cst_12 : f32 to vector<8x128xf32>
    %14 = arith.maximumf %12, %13 : vector<8x128xf32>
    %c0_13 = arith.constant 0 : index
    %c0_14 = arith.constant 0 : index
    %15 = vector.load %arg7[%c0_13, %c0_14] : memref<128x32xf32, #tpu.memory_space<vmem>>, vector<128x32xf32>
    %cst_15 = arith.constant dense<0.000000e+00> : vector<8x32xf32>
    %16 = tpu.matmul %14, %15, %cst_15 {dimension_numbers = #tpu.dot_dimension_numbers<[1], [0], [0], [1], [0, 0, 1, 1], [], []>, precision = #tpu.contract_precision<fp32>} : vector<8x128xf32>, vector<128x32xf32>, vector<8x32xf32> -> vector<8x32xf32>
    %c0_16 = arith.constant 0 : index
    %c0_17 = arith.constant 0 : index
    %17 = vector.load %arg8[%c0_16, %c0_17] : memref<1x32xf32, #tpu.memory_space<vmem>>, vector<1x32xf32>
    %18 = vector.broadcast %17 : vector<1x32xf32> to vector<8x32xf32>
    %19 = arith.addf %16, %18 : vector<8x32xf32>
    %c0_18 = arith.constant 0 : index
    %c0_19 = arith.constant 0 : index
    %c0_20 = arith.constant 0 : index
    %20 = vector.load %arg9[%c0_18, %c0_19, %c0_20] : memref<1x8x32xf32, #tpu.memory_space<vmem>>, vector<1x8x32xf32>
    %21 = vector.shape_cast %20 : vector<1x8x32xf32> to vector<8x32xf32>
    %22 = vector.shape_cast %19 : vector<8x32xf32> to vector<1x8x32xf32>
    tpu.vector_store %arg9[%c0_18, %c0_19, %c0_20], %22 {strides = array<i32>} : memref<1x8x32xf32, #tpu.memory_space<vmem>>, vector<1x8x32xf32>,
    return
  }
  func.func @transform_0(%arg0: i32, %arg1: i32) -> (i32, i32, i32) {
    %c0_i32 = arith.constant 0 : i32
    %c0_i32_0 = arith.constant 0 : i32
    return %arg1, %arg0, %c0_i32 : i32, i32, i32
  }
  func.func @transform_1(%arg0: i32, %arg1: i32) -> (i32, i32) {
    %c0_i32 = arith.constant 0 : i32
    %c0_i32_0 = arith.constant 0 : i32
    return %arg0, %c0_i32 : i32, i32
  }
  func.func @transform_2(%arg0: i32, %arg1: i32) -> (i32, i32) {
    %c0_i32 = arith.constant 0 : i32
    %c0_i32_0 = arith.constant 0 : i32
    %c0_i32_1 = arith.constant 0 : i32
    return %c0_i32, %c0_i32_0 : i32, i32
  }
  func.func @transform_3(%arg0: i32, %arg1: i32) -> (i32, i32) {
    %c0_i32 = arith.constant 0 : i32
    %c0_i32_0 = arith.constant 0 : i32
    %c0_i32_1 = arith.constant 0 : i32
    return %c0_i32, %c0_i32_0 : i32, i32
  }
  func.func @transform_4(%arg0: i32, %arg1: i32) -> (i32, i32) {
    %c0_i32 = arith.constant 0 : i32
    %c0_i32_0 = arith.constant 0 : i32
    %c0_i32_1 = arith.constant 0 : i32
    return %c0_i32, %c0_i32_0 : i32, i32
  }
  func.func @transform_5(%arg0: i32, %arg1: i32) -> (i32, i32) {
    %c0_i32 = arith.constant 0 : i32
    %c0_i32_0 = arith.constant 0 : i32
    %c0_i32_1 = arith.constant 0 : i32
    return %c0_i32, %c0_i32_0 : i32, i32
  }
  func.func @transform_6(%arg0: i32, %arg1: i32) -> (i32, i32) {
    %c0_i32 = arith.constant 0 : i32
    %c0_i32_0 = arith.constant 0 : i32
    %c0_i32_1 = arith.constant 0 : i32
    return %c0_i32, %c0_i32_0 : i32, i32
  }
  func.func @transform_7(%arg0: i32, %arg1: i32) -> (i32, i32, i32) {
    %c0_i32 = arith.constant 0 : i32
    %c0_i32_0 = arith.constant 0 : i32
    return %arg1, %arg0, %c0_i32 : i32, i32, i32
  }
}

</mosaic_0001>

<bundles_post_ra>
// kernel: tpu_custom_call.1
= control target key start
LH: loop header
LB: loop body
LE: loop exit
PB: predicated region body
PF: predicated region fallthrough
CT: control target
= control target key end

     0   :  { %12 = vsyncpa [#allocation3], 0  ;;  %s1846_s0 = inlined_call_operand.vmem [shape: f32[2,8,32], index: 0, kind: input, shape index: {}]   ;;  %s1847_s1 = inlined_call_operand.vmem [shape: f32[8,64], index: 1, kind: input, shape index: {}]   ;;  %s1848_s2 = inlined_call_operand.vmem [shape: f32[32,64], index: 2, kind: input, shape index: {}]   ;;  %s1849_s3 = inlined_call_operand.vmem [shape: f32[64,128], index: 3, kind: input, shape index: {}]   ;;  %s1850_s4 = inlined_call_operand.vmem [shape: f32[1,128], index: 4, kind: input, shape index: {}]   ;;  %s1851_s5 = inlined_call_operand.vmem [shape: f32[128,32], index: 5, kind: input, shape index: {}]   ;;  %s1852_s6 = inlined_call_operand.vmem [shape: f32[1,32], index: 6, kind: input, shape index: {}]   ;;  %s1853_s7 = inlined_call_operand.hbm [shape: f32[2,8,32], index: 7, kind: output, shape index: {}]  }
   0x1   :  { %14 = vsyncpa [#allocation3 + $0x1], 0  ;;  %s1420_s24 = smov 0   ;;  %s1422_s25 = smov 0  }
   0x2   :  { %s1424_s26 = smov 0   ;;  %s1426_s27 = smov 0  }
   0x3   :  { %s1428_s28 = smov 0   ;;  %s1430_s29 = smov 0  }
   0x4 LB: > { %s1231_s30 = sadd.s32 4294967295, %s1378_s29   ;;  %s1232_s8 = sadd.s32 4294967294, %s1378_s29   ;;  %s1378_s29 = sphi %s1430_s29, %s20_s29   ;;  %s1374_s28 = sphi %s1428_s28, %s1860_s28   ;;  %s1370_s27 = sphi %s1426_s27, %s1859_s27   ;;  %s1366_s26 = sphi %s1424_s26, %s1858_s26   ;;  %s1362_s25 = sphi %s1422_s25, %s1857_s25   ;;  %s1358_s24 = sphi %s1420_s24, %s1856_s24  }
   0x5   : > { %s29_s9 = sadd.s32 1, %s1374_s28  ;;  %s200_s10 = sadd.s32 1, %s1366_s26 }
   0x6   : > { %p30_p0 = scmp.ge.s32.totalorder %s29_s9, 2  ;;  %p210_p1 = scmp.ne.s32.totalorder %s1366_s26, %s1362_s25 }
   0x7   : > { %p211_p2 = scmp.eq.s32.totalorder %s1231_s30, 1  ;;  %p216_p3 = scmp.ne.s32.totalorder %s1362_s25, %s1358_s24 }
   0x8   : > { %s1862_s9 = smov (%p30_p0, %s29_s9), 0  ;;  %p217_p5 = scmp.eq.s32.totalorder %s1232_s8, 1 }
   0x9   : > { %p1460_p4 = por %p211_p2, %p210_p1  ;;  %s195_s12 = ssub.s32 %s1374_s28, %s1862_s9 }
   0xa   : > { %p1236_p6 = scmp.ge.s32.totalorder %s1378_s29, 1  ;;  %p198_p7 = scmp.eq.s32.totalorder %s195_s12, 0 }
   0xb   : > { %p1467_p8 = por %p217_p5, %p216_p3  ;;  %p267_p9 = scmp.lt.s32.totalorder %s1378_s29, 3 }
   0xc   : > { %s1473_s14 = scalar_select %p198_p7, %s1366_s26, %s200_s10  }
   0xd   : > { %p268_p10 = pnand %p1236_p6, %p267_p9 }
   0xe   : > { %p305_p11 = scmp.lt.s32.totalorder (!%p268_p10), %s1370_s27, 1  ;;  %s302_s17 = sand.u32 (!%p268_p10), 1, %s1362_s25  }
   0xf   : > { %271 = sbr.rel (%p268_p10) target bundleno = 495 (0x1ef), region = 48  ;;  %s1237_s18 = sshll.u32 (!%p268_p10), %s302_s17, 3 }
  0x10   : > { %s1240_s19 = sshll.u32 (!%p268_p10), %s1370_s27, 3 }
  0x11   : > { %s1140_s22 = scalar_lea.hbm (!%p268_p10), %s1853_s7, %s1240_s19 }
  0x12   : > { %s1144_s8 = sshll.u32 (!%p268_p10), %s1140_s22, 4  ;;  %s1145_s8 = int_to_ptr.hbm [resolvable:$true] %s1144_s8 }
  0x13   : > { %s1314_s10 = sshra.s32 (!%p268_p10), %s1145_s8, 4  ;;  %s1315_s10 = int_to_ptr.hbm [resolvable:$true] %s1314_s10 }
  0x14   : > { %v320_v0 = vld [vmem:[%s1848_s2 + $0x18] sm:$0xff]  ;;  %v319_v1 = vld [vmem:[%s1848_s2 + $0x10] sm:$0xff]  ;;  %v318_v2 = vld [vmem:[%s1848_s2 + $0x8] sm:$0xff]  ;;  %s306_s23 = scalar_select %p305_p11, %s1370_s27, 1  ;;  %vm322_vm0 = vcmask 261120   ;;  %vm524_vm1 = vcmask 523264  }
  0x15   : > { %v338_v3 = vand.u32 4294901760, %v320_v0  ;;  %v340_v4 = vand.u32 4294901760, %v319_v1  ;;  %v342_v5 = vand.u32 4294901760, %v318_v2  ;;  %v317_v6 = vld [vmem:[%s1848_s2] sm:$0xff]  ;;  %v519_v31 = vld [vmem:[%s1849_s3 + $0x38] sm:$0xff]  ;;  %v518_v33 = vld [vmem:[%s1849_s3 + $0x30] sm:$0xff]  ;;  %p1321_p1 = scmp.lt.s32.totalorder %s1315_s10, %s1853_s7 }
  0x16   : > { %v344_v7 = vand.u32 4294901760, %v317_v6  ;;  %s1238_s30 = sshll.u32 %s306_s23, 3  ;;  %v1496_v32 = vand.u32 4294901760, %v519_v31  ;;  %v1504_v35 = vand.u32 4294901760, %v518_v33  ;;  %v517_v36 = vld [vmem:[%s1849_s3 + $0x28] sm:$0xff]  ;;  %v516_v40 = vld [vmem:[%s1849_s3 + $0x20] sm:$0xff] }
  0x17   : > { %339 = vmatpush.msra.mxu2 %v338_v3  ;;  %v368_v8 = vsub.f32 %v320_v0, %v338_v3  ;;  %v374_v9 = vsub.f32 %v319_v1, %v340_v4  ;;  %v380_v10 = vsub.f32 %v318_v2, %v342_v5  ;;  %499 = vmatpush.msra.mxu1 %v338_v3  ;;  %s311_s12 = scalar_lea.vmem %s1846_s0, %s1238_s30  ;;  %v1515_v39 = vand.u32 4294901760, %v517_v36  ;;  %v515_v45 = vld [vmem:[%s1849_s3 + $0x18] sm:$0xff]  ;;  %v514_v51 = vld [vmem:[%s1849_s3 + $0x10] sm:$0xff]  ;;  %v513_v57 = vld [vmem:[%s1849_s3 + $0x8] sm:$0xff]  ;;  %s304_s23 = scalar_lea.vmem [#allocation2], %s1237_s18 }
  0x18   : > { %v386_v11 = vsub.f32 %v317_v6, %v344_v7  ;;  %v316_v15 = vld [vmem:[%s311_s12] sm:$0xff]  ;;  %v1502_v34 = vsub.f32 %v519_v31, %v1496_v32  ;;  %v1513_v38 = vsub.f32 %v518_v33, %v1504_v35  ;;  %v1528_v44 = vand.u32 4294901760, %v516_v40  ;;  %s1142_s30 = sshll.u32 %s304_s23, 4  ;;  %s1129_s27 = scalar_lea.sflag [#allocation3], %s302_s17  ;;  %s1143_s30 = int_to_ptr.vmem [resolvable:$true] %s1142_s30 }
  0x19   : > { %341 = vmatpush.msra.mxu2 %v340_v4  ;;  %v369_v12 = vand.u32 4294901760, %v368_v8  ;;  %v375_v13 = vand.u32 4294901760, %v374_v9  ;;  %v381_v14 = vand.u32 4294901760, %v380_v10  ;;  %501 = vmatpush.msra.mxu1 %v340_v4  ;;  %v324_v20 = vsel %vm322_vm0, %v316_v15, 0  ;;  %v512_v63 = vld [vmem:[%s1849_s3] sm:$0xff]  ;;  %s1316_s12 = scalar_lea.hbm %s1315_s10, 8 }
  0x1a   : > { %v387_v16 = vand.u32 4294901760, %v386_v11  ;;  %v346_v21 = vand.u32 4294901760, %v324_v20  ;;  %v571_v37 = vand.u32 4294901760, %v1502_v34  ;;  %v577_v42 = vand.u32 4294901760, %v1513_v38  ;;  %v321_v15 = vld [vmem:[%s1847_s1] sm:$0xff]  ;;  %p1317_p12 = scmp.ne.s32.totalorder %s1315_s10, %s1316_s12  ;;  %s1320_s18 = scalar_lea.hbm %s1853_s7, 16 }
  0x1b   : > { %v370_v17 = vsub.f32 %v368_v8, %v369_v12  ;;  %343 = vmatpush.msra.mxu2 %v342_v5  ;;  %v376_v18 = vsub.f32 %v374_v9, %v375_v13  ;;  %v382_v19 = vsub.f32 %v380_v10, %v381_v14  ;;  %468 = vmatpush.msra.mxu0 %v369_v12  ;;  %v544_v50 = vand.u32 4294901760, %v515_v45  ;;  %p1322_p2 = scmp.lt.s32.totalorder %s1320_s18, %s1316_s12 }
  0x1c   : > { %503 = vmatpush.msra.mxu1 %v342_v5  ;;  %v388_v24 = vsub.f32 %v386_v11, %v387_v16  ;;  %v347_v25 = vsub.f32 %v324_v20, %v346_v21  ;;  %v572_v41 = vsub.f32 %v1502_v34, %v571_v37  ;;  %v1526_v43 = vsub.f32 %v517_v36, %v1515_v39  ;;  %v780_v20 = vld [vmem:[%s1851_s5 + $0x70] sm:$0xff]  ;;  %p1318_p13 = pnand %p1317_p12, %p1460_p4 }
  0x1d   : > { %v371_v22 = vand.u32 4294901760, %v370_v17  ;;  %v377_v23 = vand.u32 4294901760, %v376_v18  ;;  %345 = vmatpush.msra.mxu2 %v344_v7  ;;  %472 = vmatpush.msra.mxu0 %v375_v13  ;;  %v383_v26 = vand.u32 4294901760, %v382_v19  ;;  %v578_v47 = vsub.f32 %v1513_v38, %v577_v42  ;;  %v781_v19 = vld [vmem:[%s1851_s5 + $0x78] sm:$0xff]  ;;  %p1323_p3 = por %p1322_p2, %p1321_p1 }
  0x1e   : > { %505 = vmatpush.msra.mxu1 %v344_v7  ;;  %v348_v27 = vand.u32 4294901760, %v347_v25  ;;  %v389_v28 = vand.u32 4294901760, %v388_v24  ;;  %v573_v46 = vand.u32 4294901760, %v572_v41  ;;  %v583_v48 = vand.u32 4294901760, %v1526_v43  ;;  %p1319_p0 = pneg %p1318_p13 }
  0x1f   : > { %410 = vmatpush.msrb.mxu2 %v368_v8  ;;  %372 = vmatpush.msra.mxu3 %v371_v22  ;;  %v588_v49 = vsub.f32 %v516_v40, %v1528_v44  ;;  %v579_v52 = vand.u32 4294901760, %v578_v47  ;;  %v546_v55 = vand.u32 4294901760, %v514_v51  ;;  %v594_v56 = vsub.f32 %v515_v45, %v544_v50 }
  0x20   : > { %476 = vmatpush.msra.mxu0 %v381_v14  ;;  %507 = vmatmul.f32.vlgmr.msra.gmra.mxu1 %v346_v21  ;;  %v349_v29 = vsub.f32 %v347_v25, %v348_v27  ;;  %v584_v53 = vsub.f32 %v1526_v43, %v583_v48  ;;  %v548_v61 = vand.u32 4294901760, %v513_v57  ;;  %v1570_v24 = vand.u32 4294901760, %v780_v20  ;;  %p1324_p5 = pnand %p1323_p3, %p1319_p0 }
  0x21   : > { %413 = vmatpush.msrb.mxu2 %v374_v9  ;;  %378 = vmatpush.msra.mxu3 %v377_v23  ;;  %v589_v54 = vand.u32 4294901760, %v588_v49  ;;  %v600_v60 = vsub.f32 %v514_v51, %v546_v55  ;;  %v595_v62 = vand.u32 4294901760, %v594_v56  ;;  %v1568_v23 = vand.u32 4294901760, %v781_v19 }
  0x22   : > { %480 = vmatpush.msra.mxu0 %v387_v16  ;;  %v350_v30 = vand.u32 4294901760, %v349_v29  ;;  %669 = vmatpush.msrb.mxu1 %v1496_v32  ;;  %v585_v58 = vand.u32 4294901760, %v584_v53  ;;  %v606_v2 = vsub.f32 %v513_v57, %v548_v61 }
  0x23   : > { %416 = vmatpush.msrb.mxu2 %v380_v10  ;;  %482 = vmatmul.f32.vlgmr.msra.gmra.mxu0 %v346_v21  ;;  %v590_v59 = vsub.f32 %v588_v49, %v589_v54  ;;  %v601_v1 = vand.u32 4294901760, %v600_v60  ;;  %v1593_v36 = vsub.f32 %v781_v19, %v1568_v23 }
  0x24   : > { %384 = vmatpush.msra.mxu3 %v383_v26  ;;  %351 = vmatmul.f32.vlgmr.msra.gmra.mxu2 %v350_v30  ;;  %v607_v6 = vand.u32 4294901760, %v606_v2  ;;  %v778_v26 = vld [vmem:[%s1851_s5 + $0x60] sm:$0xff] }
  0x25   : > { %419 = vmatpush.msrb.mxu2 %v386_v11  ;;  %632 = vmatpush.msrb.mxu0 %v1502_v34  ;;  %v591_v0 = vand.u32 4294901760, %v590_v59  ;;  %v1583_v31 = vand.u32 4294901760, %v778_v26  ;;  %v775_v34 = vld [vmem:[%s1851_s5 + $0x48] sm:$0xff]  ;;  %v829_v45 = vand.u32 4294901760, %v1593_v36  ;;  %v773_v59 = vld [vmem:[%s1851_s5 + $0x38] sm:$0xff] }
  0x26   : > { %390 = vmatpush.msra.mxu3 %v389_v28  ;;  %671 = vmatpush.msrb.mxu1 %v1504_v35  ;;  %v608_v10 = vsub.f32 %v606_v2, %v607_v6  ;;  %v776_v28 = vld [vmem:[%s1851_s5 + $0x50] sm:$0xff] }
  0x27   : > { %392 = vmatmul.f32.vlgmr.msra.gmra.mxu3 %v346_v21  ;;  %537 = vmatpush.msra.mxu2 %v1496_v32  ;;  %v779_v21 = vld [vmem:[%s1851_s5 + $0x68] sm:$0xff]  ;;  %v1587_v33 = vand.u32 4294901760, %v776_v28  ;;  %v1603_v40 = vsub.f32 %v778_v26, %v1583_v31  ;;  %v830_v53 = vsub.f32 %v1593_v36, %v829_v45 }
  0x28   : > { %439 = vmatpush.msrb.mxu3 %v338_v3  ;;  %635 = vmatpush.msrb.mxu0 %v1513_v38  ;;  %v550_v3 = vand.u32 4294901760, %v512_v63  ;;  %v609_v12 = vand.u32 4294901760, %v608_v10 }
  0x29   : > { %539 = vmatpush.msra.mxu2 %v1504_v35  ;;  %673 = vmatpush.msrb.mxu1 %v1515_v39 }
  0x2a   : > { %441 = vmatpush.msrb.mxu3 %v340_v4  ;;  %638 = vmatpush.msrb.mxu0 %v1526_v43  ;;  %v596_v4 = vsub.f32 %v594_v56, %v595_v62  ;;  %v1611_v43 = vand.u32 4294901760, %v775_v34 }
  0x2b   : > { %541 = vmatpush.msra.mxu2 %v1515_v39  ;;  %675 = vmatpush.msrb.mxu1 %v1528_v44 }
  0x2c   : > { %443 = vmatpush.msrb.mxu3 %v342_v5  ;;  %422 = vmatmul.f32.vlgmr.msrb.gmra.mxu2 %v347_v25  ;;  %v602_v5 = vsub.f32 %v600_v60, %v601_v1  ;;  %v597_v8 = vand.u32 4294901760, %v596_v4  ;;  %v1572_v25 = vand.u32 4294901760, %v779_v21  ;;  %v1620_v51 = vsub.f32 %v775_v34, %v1611_v43 }
  0x2d   : > { %543 = vmatpush.msra.mxu2 %v1528_v44  ;;  %641 = vmatpush.msrb.mxu0 %v588_v49  ;;  %v847_v49 = vand.u32 4294901760, %v1603_v40 }
  0x2e   : > { %445 = vmatpush.msrb.mxu3 %v344_v7  ;;  %677 = vmatpush.msrb.mxu1 %v544_v50  ;;  %v612_v7 = vsub.f32 %v512_v63, %v550_v3  ;;  %v603_v9 = vand.u32 4294901760, %v602_v5  ;;  %v1599_v38 = vsub.f32 %v779_v21, %v1572_v25  ;;  %v865_v4 = vand.u32 4294901760, %v1620_v51 }
  0x2f   : > { %449 = vmatmul.f32.vlgmr.msrb.gmra.mxu3 %v348_v27  ;;  %545 = vmatpush.msra.mxu2 %v544_v50  ;;  %v777_v27 = vld [vmem:[%s1851_s5 + $0x58] sm:$0xff] }
  0x30   : > { %574 = vmatpush.msra.mxu3 %v573_v46  ;;  %644 = vmatpush.msrb.mxu0 %v594_v56  ;;  %v613_v11 = vand.u32 4294901760, %v612_v7  ;;  %v841_v47 = vand.u32 4294901760, %v1599_v38  ;;  %v848_v56 = vsub.f32 %v1603_v40, %v847_v49 }
  0x31   : > { %547 = vmatpush.msra.mxu2 %v546_v55  ;;  %679 = vmatpush.msrb.mxu1 %v546_v55 }
  0x32   : > { %580 = vmatpush.msra.mxu3 %v579_v52  ;;  %647 = vmatpush.msrb.mxu0 %v600_v60  ;;  %v614_v13 = vsub.f32 %v612_v7, %v613_v11  ;;  %v772_v60 = vld [vmem:[%s1851_s5 + $0x30] sm:$0xff] }
  0x33   : > { %549 = vmatpush.msra.mxu2 %v548_v61  ;;  %681 = vmatpush.msrb.mxu1 %v548_v61 }
  0x34   : > { %586 = vmatpush.msra.mxu3 %v585_v58  ;;  %650 = vmatpush.msrb.mxu0 %v606_v2  ;;  %v615_v14 = vand.u32 4294901760, %v614_v13  ;;  %v774_v58 = vld [vmem:[%s1851_s5 + $0x40] sm:$0xff]  ;;  %v769_v13 = vld [vmem:[%s1851_s5 + $0x18] sm:$0xff] }
  0x35   : > { %551 = vmatpush.msra.mxu2 %v550_v3  ;;  %683 = vmatpush.msrb.mxu1 %v550_v3 }
  0x36   : > { %592 = vmatpush.msra.mxu3 %v591_v0  ;;  %653 = vmatpush.msrb.mxu0 %v612_v7  ;;  %v771_v0 = vld [vmem:[%s1851_s5 + $0x28] sm:$0xff]  ;;  %v1659_v7 = vand.u32 4294901760, %v773_v59 }
  0x37   : > { %702 = vmatpush.msrb.mxu2 %v571_v37  ;;  %v1596_v37 = vsub.f32 %v780_v20, %v1570_v24  ;;  %v866_v20 = vsub.f32 %v1620_v51, %v865_v4 }
  0x38   : > { %598 = vmatpush.msra.mxu3 %v597_v8  ;;  %787 = vmatpush.msra.mxu0 %v1568_v23  ;;  %v1661_v8 = vand.u32 4294901760, %v772_v60 }
  0x39   : > { %706 = vmatpush.msrb.mxu2 %v577_v42  ;;  %v1609_v42 = vsub.f32 %v776_v28, %v1587_v33  ;;  %v835_v46 = vand.u32 4294901760, %v1596_v37 }
  0x3a   : > { %604 = vmatpush.msra.mxu3 %v603_v9  ;;  %789 = vmatpush.msra.mxu0 %v1570_v24  ;;  %v849_v9 = vand.u32 4294901760, %v848_v56 }
  0x3b   : > { %710 = vmatpush.msrb.mxu2 %v583_v48  ;;  %v859_v57 = vand.u32 4294901760, %v1609_v42 }
  0x3c   : > { %610 = vmatpush.msra.mxu3 %v609_v12  ;;  %791 = vmatpush.msra.mxu0 %v1572_v25 }
  0x3d   : > { %714 = vmatpush.msrb.mxu2 %v589_v54  ;;  %v836_v54 = vsub.f32 %v1596_v37, %v835_v46  ;;  %v860_v10 = vsub.f32 %v1609_v42, %v859_v57 }
  0x3e   : > { %616 = vmatpush.msra.mxu3 %v615_v14  ;;  %793 = vmatpush.msra.mxu0 %v1583_v31 }
  0x3f   : > { %718 = vmatpush.msrb.mxu2 %v595_v62  ;;  %v831_v62 = vand.u32 4294901760, %v830_v53  ;;  %v837_v63 = vand.u32 4294901760, %v836_v54 }
  0x40   : > { %745 = vmatpush.msrb.mxu3 %v1496_v32  ;;  %v1585_v32 = vand.u32 4294901760, %v777_v27 }
  0x41   : > { %722 = vmatpush.msrb.mxu2 %v601_v1  ;;  %v770_v1 = vld [vmem:[%s1851_s5 + $0x20] sm:$0xff]  ;;  %832 = vmatpush.msra.mxu1 %v831_v62 }
  0x42   : > { %747 = vmatpush.msrb.mxu3 %v1504_v35  ;;  %v1606_v41 = vsub.f32 %v777_v27, %v1585_v32  ;;  %795 = vmatpush.msra.mxu0 %v1585_v32  ;;  %v1668_v12 = vand.u32 4294901760, %v770_v1  ;;  %v1692_v27 = vand.u32 4294901760, %v769_v13 }
  0x43   : > { %726 = vmatpush.msrb.mxu2 %v607_v6  ;;  %v1656_v6 = vand.u32 4294901760, %v774_v58  ;;  %838 = vmatpush.msra.mxu1 %v837_v63 }
  0x44   : > { %749 = vmatpush.msrb.mxu3 %v1515_v39  ;;  %797 = vmatpush.msra.mxu0 %v1587_v33  ;;  %v1709_v53 = vsub.f32 %v769_v13, %v1692_v27  ;;  %v767_v13 = vld [vmem:[%s1851_s5 + $0x8] sm:$0xff] }
  0x45   : > { %730 = vmatpush.msrb.mxu2 %v613_v11  ;;  %v1666_v11 = vand.u32 4294901760, %v771_v0 }
  0x46   : > { %751 = vmatpush.msrb.mxu3 %v1528_v44  ;;  %799 = vmatpush.msra.mxu0 %v1611_v43  ;;  %v901_v62 = vand.u32 4294901760, %v1709_v53 }
  0x47   : > { %v1690_v26 = vsub.f32 %v771_v0, %v1666_v11 }
  0x48   : > { %753 = vmatpush.msrb.mxu3 %v544_v50  ;;  %v853_v50 = vand.u32 4294901760, %v1606_v41  ;;  %801 = vmatpush.msra.mxu0 %v1656_v6 }
  0x4a   : > { %755 = vmatpush.msrb.mxu3 %v546_v55  ;;  %v842_v55 = vsub.f32 %v1599_v38, %v841_v47  ;;  %803 = vmatpush.msra.mxu0 %v1659_v7 }
  0x4c   : > { %757 = vmatpush.msrb.mxu3 %v548_v61  ;;  %v843_v2 = vand.u32 4294901760, %v842_v55  ;;  %805 = vmatpush.msra.mxu0 %v1661_v8 }
  0x4e   : > { %759 = vmatpush.msrb.mxu3 %v550_v3  ;;  %v854_v3 = vsub.f32 %v1606_v41, %v853_v50  ;;  %844 = vmatpush.msra.mxu1 %v843_v2  ;;  %v902_v2 = vsub.f32 %v1709_v53, %v901_v62 }
  0x4f   : > { %807 = vmatpush.msra.mxu0 %v1666_v11 }
  0x50   : > { %v855_v19 = vand.u32 4294901760, %v854_v3  ;;  %850 = vmatpush.msra.mxu1 %v849_v9  ;;  %v768_v9 = vld [vmem:[%s1851_s5 + $0x10] sm:$0xff] }
  0x51   : > { %809 = vmatpush.msra.mxu0 %v1668_v12 }
  0x52   : > { %856 = vmatpush.msra.mxu1 %v855_v19  ;;  %v766_v19 = vld [vmem:[%s1851_s5] sm:$0xff] }
  0x53   : > { %811 = vmatpush.msra.mxu0 %v1692_v27 }
  0x9d   : > { %v508_v48 = vpop.f32.mrf.mxu1 }
  0xa0   : > { %v483_v39 = vpop.f32.mrf.mxu0 }
  0xa7   : > { %v352_v16 = vpop.f32.mrf.mxu2 }
  0xa8   : > { %v353_v18 = vadd.f32 %v352_v16, %v321_v15  ;;  %v1674_v15 = vsub.f32 %v774_v58, %v1656_v6  ;;  %v1677_v16 = vsub.f32 %v773_v59, %v1659_v7 }
  0xaa   : > { %v393_v17 = vpop.f32.mrf.mxu3  ;;  %v871_v21 = vand.u32 4294901760, %v1674_v15 }
  0xab   : > { %v394_v22 = vadd.f32 %v393_v17, %v353_v18  ;;  %v1681_v17 = vsub.f32 %v772_v60, %v1661_v8 }
  0xad   : > { %v883_v34 = vand.u32 4294901760, %v1681_v17 }
  0xaf   : > { %v423_v29 = vpop.f32.mrf.mxu2  ;;  %v884_v56 = vsub.f32 %v1681_v17, %v883_v34 }
  0xb0   : > { %v424_v35 = vadd.f32 %v423_v29, %v394_v22  ;;  %v877_v22 = vand.u32 4294901760, %v1677_v16  ;;  %v861_v29 = vand.u32 4294901760, %v860_v10  ;;  %v812_v10 = vand.u32 4294901760, %v768_v9 }
  0xb1   : > { %v885_v63 = vand.u32 4294901760, %v884_v56 }
  0xb2   : > { %v450_v30 = vpop.f32.mrf.mxu3  ;;  %862 = vmatpush.msra.mxu1 %v861_v29  ;;  %813 = vmatpush.msra.mxu0 %v812_v10  ;;  %v816_v29 = vand.u32 4294901760, %v766_v19 }
  0xb3   : > { %v451_v44 = vadd.f32 %v450_v30, %v424_v35  ;;  %v872_v30 = vsub.f32 %v1674_v15, %v871_v21  ;;  %v1700_v35 = vsub.f32 %v770_v1, %v1668_v12 }
  0xb5   : > { %v484_v52 = vadd.f32 %v483_v39, %v451_v44  ;;  %v867_v44 = vand.u32 4294901760, %v866_v20  ;;  %v873_v55 = vand.u32 4294901760, %v872_v30  ;;  %v895_v58 = vand.u32 4294901760, %v1700_v35 }
  0xb7   : > { %v509_v61 = vadd.f32 %v508_v48, %v484_v52  ;;  %v878_v48 = vsub.f32 %v1677_v16, %v877_v22  ;;  %v889_v52 = vand.u32 4294901760, %v1690_v26  ;;  %868 = vmatpush.msra.mxu1 %v867_v44  ;;  %v896_v0 = vsub.f32 %v1700_v35, %v895_v58 }
  0xb8   : > { %v918_v44 = vsub.f32 %v766_v19, %v816_v29 }
  0xb9   : > { %v511_v5 = vmax.f32 %v509_v61, 0.0  ;;  %v879_v60 = vand.u32 4294901760, %v878_v48  ;;  %v890_v61 = vsub.f32 %v1690_v26, %v889_v52  ;;  %874 = vmatpush.msra.mxu1 %v873_v55  ;;  %v897_v3 = vand.u32 4294901760, %v896_v0 }
  0xba   : > { %v919_v55 = vand.u32 4294901760, %v918_v44 }
  0xbb   : > { %v526_v14 = vsel %vm524_vm1, %v511_v5, 0  ;;  %880 = vmatpush.msra.mxu1 %v879_v60  ;;  %v891_v1 = vand.u32 4294901760, %v890_v61  ;;  %v903_v5 = vand.u32 4294901760, %v902_v2 }
  0xbc   : > { %v552_v18 = vand.u32 4294901760, %v526_v14 }
  0xbd   : > { %886 = vmatpush.msra.mxu1 %v885_v63 }
  0xbe   : > { %618 = vmatmul.f32.vlgmr.msra.gmra.mxu3 %v552_v18  ;;  %v553_v28 = vsub.f32 %v526_v14, %v552_v18  ;;  %v906_v14 = vsub.f32 %v768_v9, %v812_v10 }
  0xbf   : > { %983 = vmatpush.msra.mxu3 %v1568_v23  ;;  %892 = vmatpush.msra.mxu1 %v891_v1 }
  0xc0   : > { %656 = vmatmul.f32.vlgmr.msrb.gmra.mxu0 %v553_v28  ;;  %v554_v39 = vand.u32 4294901760, %v553_v28  ;;  %v907_v20 = vand.u32 4294901760, %v906_v14 }
  0xc1   : > { %985 = vmatpush.msra.mxu3 %v1570_v24  ;;  %898 = vmatpush.msra.mxu1 %v897_v3 }
  0xc2   : > { %v555_v54 = vsub.f32 %v553_v28, %v554_v39  ;;  %687 = vmatmul.f32.vlgmr.msrb.gmra.mxu1 %v554_v39  ;;  %v908_v30 = vsub.f32 %v906_v14, %v907_v20 }
  0xc3   : > { %987 = vmatpush.msra.mxu3 %v1572_v25  ;;  %904 = vmatpush.msra.mxu1 %v903_v5 }
  0xc4   : > { %v556_v59 = vand.u32 4294901760, %v555_v54  ;;  %v909_v48 = vand.u32 4294901760, %v908_v30 }
  0xc5   : > { %989 = vmatpush.msra.mxu3 %v1583_v31 }
  0xc6   : > { %557 = vmatmul.f32.vlgmr.msra.gmra.mxu2 %v556_v59  ;;  %761 = vmatmul.f32.vlgmr.msrb.gmra.mxu3 %v552_v18  ;;  %v920_v59 = vsub.f32 %v918_v44, %v919_v55 }
  0xc7   : > { %930 = vmatpush.msra.mxu2 %v1593_v36  ;;  %991 = vmatpush.msra.mxu3 %v1585_v32 }
  0xc8   : > { %910 = vmatpush.msra.mxu1 %v909_v48  ;;  %v921_v60 = vand.u32 4294901760, %v920_v59 }
  0xc9   : > { %933 = vmatpush.msra.mxu2 %v1596_v37  ;;  %993 = vmatpush.msra.mxu3 %v1587_v33 }
  0xcb   : > { %936 = vmatpush.msra.mxu2 %v1599_v38  ;;  %995 = vmatpush.msra.mxu3 %v1611_v43 }
  0xcd   : > { %939 = vmatpush.msra.mxu2 %v1603_v40  ;;  %997 = vmatpush.msra.mxu3 %v1656_v6 }
  0xce   : > { %732 = vmatmul.f32.vlgmr.msrb.gmra.mxu2 %v552_v18  ;;  %v814_v18 = vand.u32 4294901760, %v767_v13 }
  0xcf   : > { %942 = vmatpush.msra.mxu2 %v1606_v41  ;;  %999 = vmatpush.msra.mxu3 %v1659_v7 }
  0xd0   : > { %v912_v28 = vsub.f32 %v767_v13, %v814_v18  ;;  %815 = vmatpush.msra.mxu0 %v814_v18 }
  0xd1   : > { %945 = vmatpush.msra.mxu2 %v1609_v42  ;;  %1001 = vmatpush.msra.mxu3 %v1661_v8 }
  0xd2   : > { %v913_v39 = vand.u32 4294901760, %v912_v28  ;;  %817 = vmatpush.msra.mxu0 %v816_v29 }
  0xd3   : > { %948 = vmatpush.msra.mxu2 %v1620_v51  ;;  %1003 = vmatpush.msra.mxu3 %v1666_v11 }
  0xd4   : > { %1024 = vmatpush.msrb.mxu0 %v829_v45  ;;  %v914_v54 = vsub.f32 %v912_v28, %v913_v39 }
  0xd5   : > { %951 = vmatpush.msra.mxu2 %v1674_v15  ;;  %1005 = vmatpush.msra.mxu3 %v1668_v12 }
  0xd6   : > { %1028 = vmatpush.msrb.mxu0 %v835_v46  ;;  %v915_v56 = vand.u32 4294901760, %v914_v54 }
  0xd7   : > { %954 = vmatpush.msra.mxu2 %v1677_v16  ;;  %1007 = vmatpush.msra.mxu3 %v1692_v27 }
  0xd8   : > { %1032 = vmatpush.msrb.mxu0 %v841_v47  ;;  %916 = vmatpush.msra.mxu1 %v915_v56 }
  0xd9   : > { %957 = vmatpush.msra.mxu2 %v1681_v17  ;;  %1009 = vmatpush.msra.mxu3 %v812_v10 }
  0xda   : > { %1036 = vmatpush.msrb.mxu0 %v847_v49  ;;  %922 = vmatpush.msra.mxu1 %v921_v60 }
  0xdb   : > { %960 = vmatpush.msra.mxu2 %v1690_v26  ;;  %1011 = vmatpush.msra.mxu3 %v814_v18 }
  0xdc   : > { %1091 = vmatpush.msrb.mxu1 %v1568_v23  ;;  %1040 = vmatpush.msrb.mxu0 %v853_v50  ;;  %v1298_v23 = vld [vmem:[%s1850_s4] ss:$0 sm:$0xff] }
  0xdd   : > { %963 = vmatpush.msra.mxu2 %v1700_v35  ;;  %1013 = vmatpush.msra.mxu3 %v816_v29 }
  0xde   : > { %1093 = vmatpush.msrb.mxu1 %v1570_v24  ;;  %1044 = vmatpush.msrb.mxu0 %v859_v57  ;;  %v1299_v57 = vld [vmem:[%s1852_s6] ss:$0 sm:$0xff] }
  0xdf   : > { %966 = vmatpush.msra.mxu2 %v1709_v53 }
  0xe0   : > { %1095 = vmatpush.msrb.mxu1 %v1572_v25  ;;  %1048 = vmatpush.msrb.mxu0 %v865_v4 }
  0xe1   : > { %969 = vmatpush.msra.mxu2 %v906_v14 }
  0xe2   : > { %1097 = vmatpush.msrb.mxu1 %v1583_v31  ;;  %1052 = vmatpush.msrb.mxu0 %v871_v21 }
  0xe3   : > { %972 = vmatpush.msra.mxu2 %v912_v28 }
  0xe4   : > { %1099 = vmatpush.msrb.mxu1 %v1585_v32  ;;  %1056 = vmatpush.msrb.mxu0 %v877_v22 }
  0xe5   : > { %975 = vmatpush.msra.mxu2 %v918_v44 }
  0xe6   : > { %1101 = vmatpush.msrb.mxu1 %v1587_v33  ;;  %1060 = vmatpush.msrb.mxu0 %v883_v34 }
  0xe8   : > { %1103 = vmatpush.msrb.mxu1 %v1611_v43  ;;  %1064 = vmatpush.msrb.mxu0 %v889_v52 }
  0xea   : > { %1105 = vmatpush.msrb.mxu1 %v1656_v6  ;;  %1068 = vmatpush.msrb.mxu0 %v895_v58 }
  0xec   : > { %1107 = vmatpush.msrb.mxu1 %v1659_v7  ;;  %1072 = vmatpush.msrb.mxu0 %v901_v62 }
  0xee   : > { %1109 = vmatpush.msrb.mxu1 %v1661_v8  ;;  %1076 = vmatpush.msrb.mxu0 %v907_v20 }
  0xf0   : > { %1111 = vmatpush.msrb.mxu1 %v1666_v11  ;;  %1080 = vmatpush.msrb.mxu0 %v913_v39 }
  0xf2   : > { %1113 = vmatpush.msrb.mxu1 %v1668_v12  ;;  %1084 = vmatpush.msrb.mxu0 %v919_v55 }
  0xf4   : > { %1115 = vmatpush.msrb.mxu1 %v1692_v27 }
  0xf6   : > { %1117 = vmatpush.msrb.mxu1 %v812_v10 }
  0xf8   : > { %1119 = vmatpush.msrb.mxu1 %v814_v18 }
  0xfa   : > { %1121 = vmatpush.msrb.mxu1 %v816_v29 }
 0x13d   : > { %v657_v33 = vpop.f32.mrf.mxu0 }
 0x13f   : > { %v688_v37 = vpop.f32.mrf.mxu1 }
 0x141   : > { %v619_v24 = vpop.f32.mrf.mxu3 }
 0x149   : > { %v558_v25 = vpop.f32.mrf.mxu2  ;;  %v762_v42 = vpop.f32.mrf.mxu3 }
 0x14a   : > { %v559_v31 = vadd.f32 %v1298_v23, %v558_v25 }
 0x14c   : > { %v620_v32 = vadd.f32 %v619_v24, %v559_v31 }
 0x14e   : > { %v658_v36 = vadd.f32 %v657_v33, %v620_v32 }
 0x150   : > { %v689_v38 = vadd.f32 %v688_v37, %v658_v36 }
 0x151   : > { %v733_v40 = vpop.f32.mrf.mxu2 }
 0x152   : > { %v734_v41 = vadd.f32 %v733_v40, %v689_v38 }
 0x154   : > { %v763_v43 = vadd.f32 %v762_v42, %v734_v41 }
 0x156   : > { %v765_v45 = vmax.f32 %v763_v43, 0.0 }
 0x158   : > { %v818_v46 = vand.u32 4294901760, %v765_v45 }
 0x15a   : > { %v819_v47 = vsub.f32 %v765_v45, %v818_v46  ;;  %924 = vmatmul.f32.vlgmr.msra.gmra.mxu1 %v818_v46 }
 0x15c   : > { %978 = vmatmul.f32.vlgmr.msra.gmra.mxu2 %v819_v47  ;;  %v820_v49 = vand.u32 4294901760, %v819_v47 }
 0x15e   : > { %1017 = vmatmul.f32.vlgmr.msra.gmra.mxu3 %v820_v49  ;;  %v821_v50 = vsub.f32 %v819_v47, %v820_v49 }
 0x160   : > { %v822_v51 = vand.u32 4294901760, %v821_v50 }
 0x162   : > { %823 = vmatmul.f32.vlgmr.msra.gmra.mxu0 %v822_v51  ;;  %1123 = vmatmul.f32.vlgmr.msrb.gmra.mxu1 %v818_v46 }
 0x16a   : > { %1086 = vmatmul.f32.vlgmr.msrb.gmra.mxu0 %v818_v46 }
 0x1d7   : > { %v925_v4 = vpop.f32.mrf.mxu1 }
 0x1df   : > { %v824_v6 = vpop.f32.mrf.mxu0  ;;  %v979_v11 = vpop.f32.mrf.mxu2 }
 0x1e0   : > { %v825_v7 = vadd.f32 %v1299_v57, %v824_v6  ;;  %v1124_v22 = vpop.f32.mrf.mxu1 }
 0x1e1   : > { %v1018_v15 = vpop.f32.mrf.mxu3 }
 0x1e2   : > { %v926_v8 = vadd.f32 %v925_v4, %v825_v7 }
 0x1e4   : > { %v980_v12 = vadd.f32 %v979_v11, %v926_v8 }
 0x1e6   : > { %v1019_v16 = vadd.f32 %v1018_v15, %v980_v12 }
 0x1e7   : > { %v1087_v17 = vpop.f32.mrf.mxu0 }
 0x1e8   : > { %v1088_v21 = vadd.f32 %v1087_v17, %v1019_v16 }
 0x1ea   : > { %v1125_v26 = vadd.f32 %v1124_v22, %v1088_v21 }
 0x1ec   : > { %1127 = vst.msk [vmem:[%s304_s23] sm:$0xff] %vm322_vm0, %v1125_v26 }
 0x1ed   : > { %1327 = shalt.err (!%p1324_p5)
}
 0x1ee   : > { %1243 = dma.vmem_to_hbm [thread:$0]  (%p1460_p4), %s1143_s30, 128, %s1145_s8, %s1129_s27  }
 0x1ef PF: > { %p1249_p6 = scmp.ge.s32.totalorder %s1378_s29, 2  ;;  %s1156_s17 = sand.u32 1, %s1358_s24  }
 0x1f0   : > { %s1157_s21 = scalar_lea.sflag [#allocation3], %s1156_s17 }
 0x1f1   : > { %p1246_p7 = pnand %p1249_p6, %p1467_p8 }
 0x1f3   : > { %p1247_p9 = pneg %p1246_p7 }
 0x1f5   : > { %1353 = dma.done.wait (%p1247_p9), %s1157_s21, 128  }
 0x1f6   : > { %1355 = vsyncadd (%p1247_p9), %s1157_s21, 4294967168  ;;  %s20_s29 = sadd.s32 1, %s1378_s29   ;;  %s1856_s24 = smov %s1362_s25 }
 0x1f7   : > { %p17_p10 = scmp.ge.s32.totalorder %s20_s29, 4   ;;  %s1857_s25 = smov %s1366_s26 }
 0x1f8   : > { %s1858_s26 = smov %s1473_s14  ;;  %s1859_s27 = smov %s1374_s28 }
 0x1f9   : > { %s1860_s28 = smov %s1862_s9  ;;  %19 = sbr.rel (!%p17_p10) target bundleno = 4 (0x4), region = 86 }
 0x1fe   :  { %1163 = vsyncpa [#allocation3], 1 }
 0x1ff   :  { %1165 = vsyncpa [#allocation3 + $0x1], 1 }

// kernel: tpu_custom_call.1
= control target key start
LH: loop header
LB: loop body
LE: loop exit
PB: predicated region body
PF: predicated region fallthrough
CT: control target
= control target key end

     0   :  { %12 = vsyncpa [#allocation3], 0  ;;  %s1846_s0 = inlined_call_operand.vmem [shape: f32[2,8,32], index: 0, kind: input, shape index: {}]   ;;  %s1847_s1 = inlined_call_operand.vmem [shape: f32[8,64], index: 1, kind: input, shape index: {}]   ;;  %s1848_s2 = inlined_call_operand.vmem [shape: f32[32,64], index: 2, kind: input, shape index: {}]   ;;  %s1849_s3 = inlined_call_operand.vmem [shape: f32[64,128], index: 3, kind: input, shape index: {}]   ;;  %s1850_s4 = inlined_call_operand.vmem [shape: f32[1,128], index: 4, kind: input, shape index: {}]   ;;  %s1851_s5 = inlined_call_operand.vmem [shape: f32[128,32], index: 5, kind: input, shape index: {}]   ;;  %s1852_s6 = inlined_call_operand.vmem [shape: f32[1,32], index: 6, kind: input, shape index: {}]   ;;  %s1853_s7 = inlined_call_operand.hbm [shape: f32[2,8,32], index: 7, kind: output, shape index: {}]  }
   0x1   :  { %14 = vsyncpa [#allocation3 + $0x1], 0  ;;  %s1420_s24 = smov 0   ;;  %s1422_s25 = smov 0  }
   0x2   :  { %s1424_s26 = smov 0   ;;  %s1426_s27 = smov 0  }
   0x3   :  { %s1428_s28 = smov 0   ;;  %s1430_s29 = smov 0  }
   0x4 LB: > { %s1231_s30 = sadd.s32 4294967295, %s1378_s29   ;;  %s1232_s8 = sadd.s32 4294967294, %s1378_s29   ;;  %s1378_s29 = sphi %s1430_s29, %s20_s29   ;;  %s1374_s28 = sphi %s1428_s28, %s1860_s28   ;;  %s1370_s27 = sphi %s1426_s27, %s1859_s27   ;;  %s1366_s26 = sphi %s1424_s26, %s1858_s26   ;;  %s1362_s25 = sphi %s1422_s25, %s1857_s25   ;;  %s1358_s24 = sphi %s1420_s24, %s1856_s24  }
   0x5   : > { %s29_s9 = sadd.s32 1, %s1374_s28  ;;  %s200_s10 = sadd.s32 1, %s1366_s26 }
   0x6   : > { %p30_p0 = scmp.ge.s32.totalorder %s29_s9, 2  ;;  %p210_p1 = scmp.ne.s32.totalorder %s1366_s26, %s1362_s25 }
   0x7   : > { %p211_p2 = scmp.eq.s32.totalorder %s1231_s30, 1  ;;  %p216_p3 = scmp.ne.s32.totalorder %s1362_s25, %s1358_s24 }
   0x8   : > { %s1862_s9 = smov (%p30_p0, %s29_s9), 0  ;;  %p217_p5 = scmp.eq.s32.totalorder %s1232_s8, 1 }
   0x9   : > { %p1460_p4 = por %p211_p2, %p210_p1  ;;  %s195_s12 = ssub.s32 %s1374_s28, %s1862_s9 }
   0xa   : > { %p1236_p6 = scmp.ge.s32.totalorder %s1378_s29, 1  ;;  %p198_p7 = scmp.eq.s32.totalorder %s195_s12, 0 }
   0xb   : > { %p1467_p8 = por %p217_p5, %p216_p3  ;;  %p267_p9 = scmp.lt.s32.totalorder %s1378_s29, 3 }
   0xc   : > { %s1473_s14 = scalar_select %p198_p7, %s1366_s26, %s200_s10  }
   0xd   : > { %p268_p10 = pnand %p1236_p6, %p267_p9 }
   0xe   : > { %p305_p11 = scmp.lt.s32.totalorder (!%p268_p10), %s1370_s27, 1  ;;  %s302_s17 = sand.u32 (!%p268_p10), 1, %s1362_s25  }
   0xf   : > { %271 = sbr.rel (%p268_p10) target bundleno = 495 (0x1ef), region = 48  ;;  %s1237_s18 = sshll.u32 (!%p268_p10), %s302_s17, 3 }
  0x10   : > { %s1240_s19 = sshll.u32 (!%p268_p10), %s1370_s27, 3 }
  0x11   : > { %s1140_s22 = scalar_lea.hbm (!%p268_p10), %s1853_s7, %s1240_s19 }
  0x12   : > { %s1144_s8 = sshll.u32 (!%p268_p10), %s1140_s22, 4  ;;  %s1145_s8 = int_to_ptr.hbm [resolvable:$true] %s1144_s8 }
  0x13   : > { %s1314_s10 = sshra.s32 (!%p268_p10), %s1145_s8, 4  ;;  %s1315_s10 = int_to_ptr.hbm [resolvable:$true] %s1314_s10 }
  0x14   : > { %v320_v0 = vld [vmem:[%s1848_s2 + $0x18] sm:$0xff]  ;;  %v319_v1 = vld [vmem:[%s1848_s2 + $0x10] sm:$0xff]  ;;  %v318_v2 = vld [vmem:[%s1848_s2 + $0x8] sm:$0xff]  ;;  %s306_s23 = scalar_select %p305_p11, %s1370_s27, 1  ;;  %vm322_vm0 = vcmask 261120   ;;  %vm524_vm1 = vcmask 523264  }
  0x15   : > { %v338_v3 = vand.u32 4294901760, %v320_v0  ;;  %v340_v4 = vand.u32 4294901760, %v319_v1  ;;  %v342_v5 = vand.u32 4294901760, %v318_v2  ;;  %v317_v6 = vld [vmem:[%s1848_s2] sm:$0xff]  ;;  %v519_v31 = vld [vmem:[%s1849_s3 + $0x38] sm:$0xff]  ;;  %v518_v33 = vld [vmem:[%s1849_s3 + $0x30] sm:$0xff]  ;;  %p1321_p1 = scmp.lt.s32.totalorder %s1315_s10, %s1853_s7 }
  0x16   : > { %v344_v7 = vand.u32 4294901760, %v317_v6  ;;  %s1238_s30 = sshll.u32 %s306_s23, 3  ;;  %v1496_v32 = vand.u32 4294901760, %v519_v31  ;;  %v1504_v35 = vand.u32 4294901760, %v518_v33  ;;  %v517_v36 = vld [vmem:[%s1849_s3 + $0x28] sm:$0xff]  ;;  %v516_v40 = vld [vmem:[%s1849_s3 + $0x20] sm:$0xff] }
  0x17   : > { %339 = vmatpush.msra.mxu2 %v338_v3  ;;  %v368_v8 = vsub.f32 %v320_v0, %v338_v3  ;;  %v374_v9 = vsub.f32 %v319_v1, %v340_v4  ;;  %v380_v10 = vsub.f32 %v318_v2, %v342_v5  ;;  %499 = vmatpush.msra.mxu1 %v338_v3  ;;  %s311_s12 = scalar_lea.vmem %s1846_s0, %s1238_s30  ;;  %v1515_v39 = vand.u32 4294901760, %v517_v36  ;;  %v515_v45 = vld [vmem:[%s1849_s3 + $0x18] sm:$0xff]  ;;  %v514_v51 = vld [vmem:[%s1849_s3 + $0x10] sm:$0xff]  ;;  %v513_v57 = vld [vmem:[%s1849_s3 + $0x8] sm:$0xff]  ;;  %s304_s23 = scalar_lea.vmem [#allocation2], %s1237_s18 }
  0x18   : > { %v386_v11 = vsub.f32 %v317_v6, %v344_v7  ;;  %v316_v15 = vld [vmem:[%s311_s12] sm:$0xff]  ;;  %v1502_v34 = vsub.f32 %v519_v31, %v1496_v32  ;;  %v1513_v38 = vsub.f32 %v518_v33, %v1504_v35  ;;  %v1528_v44 = vand.u32 4294901760, %v516_v40  ;;  %s1142_s30 = sshll.u32 %s304_s23, 4  ;;  %s1129_s27 = scalar_lea.sflag [#allocation3], %s302_s17  ;;  %s1143_s30 = int_to_ptr.vmem [resolvable:$true] %s1142_s30 }
  0x19   : > { %341 = vmatpush.msra.mxu2 %v340_v4  ;;  %v369_v12 = vand.u32 4294901760, %v368_v8  ;;  %v375_v13 = vand.u32 4294901760, %v374_v9  ;;  %v381_v14 = vand.u32 4294901760, %v380_v10  ;;  %501 = vmatpush.msra.mxu1 %v340_v4  ;;  %v324_v20 = vsel %vm322_vm0, %v316_v15, 0  ;;  %v512_v63 = vld [vmem:[%s1849_s3] sm:$0xff]  ;;  %s1316_s12 = scalar_lea.hbm %s1315_s10, 8 }
  0x1a   : > { %v387_v16 = vand.u32 4294901760, %v386_v11  ;;  %v346_v21 = vand.u32 4294901760, %v324_v20  ;;  %v571_v37 = vand.u32 4294901760, %v1502_v34  ;;  %v577_v42 = vand.u32 4294901760, %v1513_v38  ;;  %v321_v15 = vld [vmem:[%s1847_s1] sm:$0xff]  ;;  %p1317_p12 = scmp.ne.s32.totalorder %s1315_s10, %s1316_s12  ;;  %s1320_s18 = scalar_lea.hbm %s1853_s7, 16 }
  0x1b   : > { %v370_v17 = vsub.f32 %v368_v8, %v369_v12  ;;  %343 = vmatpush.msra.mxu2 %v342_v5  ;;  %v376_v18 = vsub.f32 %v374_v9, %v375_v13  ;;  %v382_v19 = vsub.f32 %v380_v10, %v381_v14  ;;  %468 = vmatpush.msra.mxu0 %v369_v12  ;;  %v544_v50 = vand.u32 4294901760, %v515_v45  ;;  %p1322_p2 = scmp.lt.s32.totalorder %s1320_s18, %s1316_s12 }
  0x1c   : > { %503 = vmatpush.msra.mxu1 %v342_v5  ;;  %v388_v24 = vsub.f32 %v386_v11, %v387_v16  ;;  %v347_v25 = vsub.f32 %v324_v20, %v346_v21  ;;  %v572_v41 = vsub.f32 %v1502_v34, %v571_v37  ;;  %v1526_v43 = vsub.f32 %v517_v36, %v1515_v39  ;;  %v780_v20 = vld [vmem:[%s1851_s5 + $0x70] sm:$0xff]  ;;  %p1318_p13 = pnand %p1317_p12, %p1460_p4 }
  0x1d   : > { %v371_v22 = vand.u32 4294901760, %v370_v17  ;;  %v377_v23 = vand.u32 4294901760, %v376_v18  ;;  %345 = vmatpush.msra.mxu2 %v344_v7  ;;  %472 = vmatpush.msra.mxu0 %v375_v13  ;;  %v383_v26 = vand.u32 4294901760, %v382_v19  ;;  %v578_v47 = vsub.f32 %v1513_v38, %v577_v42  ;;  %v781_v19 = vld [vmem:[%s1851_s5 + $0x78] sm:$0xff]  ;;  %p1323_p3 = por %p1322_p2, %p1321_p1 }
  0x1e   : > { %505 = vmatpush.msra.mxu1 %v344_v7  ;;  %v348_v27 = vand.u32 4294901760, %v347_v25  ;;  %v389_v28 = vand.u32 4294901760, %v388_v24  ;;  %v573_v46 = vand.u32 4294901760, %v572_v41  ;;  %v583_v48 = vand.u32 4294901760, %v1526_v43  ;;  %p1319_p0 = pneg %p1318_p13 }
  0x1f   : > { %410 = vmatpush.msrb.mxu2 %v368_v8  ;;  %372 = vmatpush.msra.mxu3 %v371_v22  ;;  %v588_v49 = vsub.f32 %v516_v40, %v1528_v44  ;;  %v579_v52 = vand.u32 4294901760, %v578_v47  ;;  %v546_v55 = vand.u32 4294901760, %v514_v51  ;;  %v594_v56 = vsub.f32 %v515_v45, %v544_v50 }
  0x20   : > { %476 = vmatpush.msra.mxu0 %v381_v14  ;;  %507 = vmatmul.f32.vlgmr.msra.gmra.mxu1 %v346_v21  ;;  %v349_v29 = vsub.f32 %v347_v25, %v348_v27  ;;  %v584_v53 = vsub.f32 %v1526_v43, %v583_v48  ;;  %v548_v61 = vand.u32 4294901760, %v513_v57  ;;  %v1570_v24 = vand.u32 4294901760, %v780_v20  ;;  %p1324_p5 = pnand %p1323_p3, %p1319_p0 }
  0x21   : > { %413 = vmatpush.msrb.mxu2 %v374_v9  ;;  %378 = vmatpush.msra.mxu3 %v377_v23  ;;  %v589_v54 = vand.u32 4294901760, %v588_v49  ;;  %v600_v60 = vsub.f32 %v514_v51, %v546_v55  ;;  %v595_v62 = vand.u32 4294901760, %v594_v56  ;;  %v1568_v23 = vand.u32 4294901760, %v781_v19 }
  0x22   : > { %480 = vmatpush.msra.mxu0 %v387_v16  ;;  %v350_v30 = vand.u32 4294901760, %v349_v29  ;;  %669 = vmatpush.msrb.mxu1 %v1496_v32  ;;  %v585_v58 = vand.u32 4294901760, %v584_v53  ;;  %v606_v2 = vsub.f32 %v513_v57, %v548_v61 }
  0x23   : > { %416 = vmatpush.msrb.mxu2 %v380_v10  ;;  %482 = vmatmul.f32.vlgmr.msra.gmra.mxu0 %v346_v21  ;;  %v590_v59 = vsub.f32 %v588_v49, %v589_v54  ;;  %v601_v1 = vand.u32 4294901760, %v600_v60  ;;  %v1593_v36 = vsub.f32 %v781_v19, %v1568_v23 }
  0x24   : > { %384 = vmatpush.msra.mxu3 %v383_v26  ;;  %351 = vmatmul.f32.vlgmr.msra.gmra.mxu2 %v350_v30  ;;  %v607_v6 = vand.u32 4294901760, %v606_v2  ;;  %v778_v26 = vld [vmem:[%s1851_s5 + $0x60] sm:$0xff] }
  0x25   : > { %419 = vmatpush.msrb.mxu2 %v386_v11  ;;  %632 = vmatpush.msrb.mxu0 %v1502_v34  ;;  %v591_v0 = vand.u32 4294901760, %v590_v59  ;;  %v1583_v31 = vand.u32 4294901760, %v778_v26  ;;  %v775_v34 = vld [vmem:[%s1851_s5 + $0x48] sm:$0xff]  ;;  %v829_v45 = vand.u32 4294901760, %v1593_v36  ;;  %v773_v59 = vld [vmem:[%s1851_s5 + $0x38] sm:$0xff] }
  0x26   : > { %390 = vmatpush.msra.mxu3 %v389_v28  ;;  %671 = vmatpush.msrb.mxu1 %v1504_v35  ;;  %v608_v10 = vsub.f32 %v606_v2, %v607_v6  ;;  %v776_v28 = vld [vmem:[%s1851_s5 + $0x50] sm:$0xff] }
  0x27   : > { %392 = vmatmul.f32.vlgmr.msra.gmra.mxu3 %v346_v21  ;;  %537 = vmatpush.msra.mxu2 %v1496_v32  ;;  %v779_v21 = vld [vmem:[%s1851_s5 + $0x68] sm:$0xff]  ;;  %v1587_v33 = vand.u32 4294901760, %v776_v28  ;;  %v1603_v40 = vsub.f32 %v778_v26, %v1583_v31  ;;  %v830_v53 = vsub.f32 %v1593_v36, %v829_v45 }
  0x28   : > { %439 = vmatpush.msrb.mxu3 %v338_v3  ;;  %635 = vmatpush.msrb.mxu0 %v1513_v38  ;;  %v550_v3 = vand.u32 4294901760, %v512_v63  ;;  %v609_v12 = vand.u32 4294901760, %v608_v10 }
  0x29   : > { %539 = vmatpush.msra.mxu2 %v1504_v35  ;;  %673 = vmatpush.msrb.mxu1 %v1515_v39 }
  0x2a   : > { %441 = vmatpush.msrb.mxu3 %v340_v4  ;;  %638 = vmatpush.msrb.mxu0 %v1526_v43  ;;  %v596_v4 = vsub.f32 %v594_v56, %v595_v62  ;;  %v1611_v43 = vand.u32 4294901760, %v775_v34 }
  0x2b   : > { %541 = vmatpush.msra.mxu2 %v1515_v39  ;;  %675 = vmatpush.msrb.mxu1 %v1528_v44 }
  0x2c   : > { %443 = vmatpush.msrb.mxu3 %v342_v5  ;;  %422 = vmatmul.f32.vlgmr.msrb.gmra.mxu2 %v347_v25  ;;  %v602_v5 = vsub.f32 %v600_v60, %v601_v1  ;;  %v597_v8 = vand.u32 4294901760, %v596_v4  ;;  %v1572_v25 = vand.u32 4294901760, %v779_v21  ;;  %v1620_v51 = vsub.f32 %v775_v34, %v1611_v43 }
  0x2d   : > { %543 = vmatpush.msra.mxu2 %v1528_v44  ;;  %641 = vmatpush.msrb.mxu0 %v588_v49  ;;  %v847_v49 = vand.u32 4294901760, %v1603_v40 }
  0x2e   : > { %445 = vmatpush.msrb.mxu3 %v344_v7  ;;  %677 = vmatpush.msrb.mxu1 %v544_v50  ;;  %v612_v7 = vsub.f32 %v512_v63, %v550_v3  ;;  %v603_v9 = vand.u32 4294901760, %v602_v5  ;;  %v1599_v38 = vsub.f32 %v779_v21, %v1572_v25  ;;  %v865_v4 = vand.u32 4294901760, %v1620_v51 }
  0x2f   : > { %449 = vmatmul.f32.vlgmr.msrb.gmra.mxu3 %v348_v27  ;;  %545 = vmatpush.msra.mxu2 %v544_v50  ;;  %v777_v27 = vld [vmem:[%s1851_s5 + $0x58] sm:$0xff] }
  0x30   : > { %574 = vmatpush.msra.mxu3 %v573_v46  ;;  %644 = vmatpush.msrb.mxu0 %v594_v56  ;;  %v613_v11 = vand.u32 4294901760, %v612_v7  ;;  %v841_v47 = vand.u32 4294901760, %v1599_v38  ;;  %v848_v56 = vsub.f32 %v1603_v40, %v847_v49 }
  0x31   : > { %547 = vmatpush.msra.mxu2 %v546_v55  ;;  %679 = vmatpush.msrb.mxu1 %v546_v55 }
  0x32   : > { %580 = vmatpush.msra.mxu3 %v579_v52  ;;  %647 = vmatpush.msrb.mxu0 %v600_v60  ;;  %v614_v13 = vsub.f32 %v612_v7, %v613_v11  ;;  %v772_v60 = vld [vmem:[%s1851_s5 + $0x30] sm:$0xff] }
  0x33   : > { %549 = vmatpush.msra.mxu2 %v548_v61  ;;  %681 = vmatpush.msrb.mxu1 %v548_v61 }
  0x34   : > { %586 = vmatpush.msra.mxu3 %v585_v58  ;;  %650 = vmatpush.msrb.mxu0 %v606_v2  ;;  %v615_v14 = vand.u32 4294901760, %v614_v13  ;;  %v774_v58 = vld [vmem:[%s1851_s5 + $0x40] sm:$0xff]  ;;  %v769_v13 = vld [vmem:[%s1851_s5 + $0x18] sm:$0xff] }
  0x35   : > { %551 = vmatpush.msra.mxu2 %v550_v3  ;;  %683 = vmatpush.msrb.mxu1 %v550_v3 }
  0x36   : > { %592 = vmatpush.msra.mxu3 %v591_v0  ;;  %653 = vmatpush.msrb.mxu0 %v612_v7  ;;  %v771_v0 = vld [vmem:[%s1851_s5 + $0x28] sm:$0xff]  ;;  %v1659_v7 = vand.u32 4294901760, %v773_v59 }
  0x37   : > { %702 = vmatpush.msrb.mxu2 %v571_v37  ;;  %v1596_v37 = vsub.f32 %v780_v20, %v1570_v24  ;;  %v866_v20 = vsub.f32 %v1620_v51, %v865_v4 }
  0x38   : > { %598 = vmatpush.msra.mxu3 %v597_v8  ;;  %787 = vmatpush.msra.mxu0 %v1568_v23  ;;  %v1661_v8 = vand.u32 4294901760, %v772_v60 }
  0x39   : > { %706 = vmatpush.msrb.mxu2 %v577_v42  ;;  %v1609_v42 = vsub.f32 %v776_v28, %v1587_v33  ;;  %v835_v46 = vand.u32 4294901760, %v1596_v37 }
  0x3a   : > { %604 = vmatpush.msra.mxu3 %v603_v9  ;;  %789 = vmatpush.msra.mxu0 %v1570_v24  ;;  %v849_v9 = vand.u32 4294901760, %v848_v56 }
  0x3b   : > { %710 = vmatpush.msrb.mxu2 %v583_v48  ;;  %v859_v57 = vand.u32 4294901760, %v1609_v42 }
  0x3c   : > { %610 = vmatpush.msra.mxu3 %v609_v12  ;;  %791 = vmatpush.msra.mxu0 %v1572_v25 }
  0x3d   : > { %714 = vmatpush.msrb.mxu2 %v589_v54  ;;  %v836_v54 = vsub.f32 %v1596_v37, %v835_v46  ;;  %v860_v10 = vsub.f32 %v1609_v42, %v859_v57 }
  0x3e   : > { %616 = vmatpush.msra.mxu3 %v615_v14  ;;  %793 = vmatpush.msra.mxu0 %v1583_v31 }
  0x3f   : > { %718 = vmatpush.msrb.mxu2 %v595_v62  ;;  %v831_v62 = vand.u32 4294901760, %v830_v53  ;;  %v837_v63 = vand.u32 4294901760, %v836_v54 }
  0x40   : > { %745 = vmatpush.msrb.mxu3 %v1496_v32  ;;  %v1585_v32 = vand.u32 4294901760, %v777_v27 }
  0x41   : > { %722 = vmatpush.msrb.mxu2 %v601_v1  ;;  %v770_v1 = vld [vmem:[%s1851_s5 + $0x20] sm:$0xff]  ;;  %832 = vmatpush.msra.mxu1 %v831_v62 }
  0x42   : > { %747 = vmatpush.msrb.mxu3 %v1504_v35  ;;  %v1606_v41 = vsub.f32 %v777_v27, %v1585_v32  ;;  %795 = vmatpush.msra.mxu0 %v1585_v32  ;;  %v1668_v12 = vand.u32 4294901760, %v770_v1  ;;  %v1692_v27 = vand.u32 4294901760, %v769_v13 }
  0x43   : > { %726 = vmatpush.msrb.mxu2 %v607_v6  ;;  %v1656_v6 = vand.u32 4294901760, %v774_v58  ;;  %838 = vmatpush.msra.mxu1 %v837_v63 }
  0x44   : > { %749 = vmatpush.msrb.mxu3 %v1515_v39  ;;  %797 = vmatpush.msra.mxu0 %v1587_v33  ;;  %v1709_v53 = vsub.f32 %v769_v13, %v1692_v27  ;;  %v767_v13 = vld [vmem:[%s1851_s5 + $0x8] sm:$0xff] }
  0x45   : > { %730 = vmatpush.msrb.mxu2 %v613_v11  ;;  %v1666_v11 = vand.u32 4294901760, %v771_v0 }
  0x46   : > { %751 = vmatpush.msrb.mxu3 %v1528_v44  ;;  %799 = vmatpush.msra.mxu0 %v1611_v43  ;;  %v901_v62 = vand.u32 4294901760, %v1709_v53 }
  0x47   : > { %v1690_v26 = vsub.f32 %v771_v0, %v1666_v11 }
  0x48   : > { %753 = vmatpush.msrb.mxu3 %v544_v50  ;;  %v853_v50 = vand.u32 4294901760, %v1606_v41  ;;  %801 = vmatpush.msra.mxu0 %v1656_v6 }
  0x4a   : > { %755 = vmatpush.msrb.mxu3 %v546_v55  ;;  %v842_v55 = vsub.f32 %v1599_v38, %v841_v47  ;;  %803 = vmatpush.msra.mxu0 %v1659_v7 }
  0x4c   : > { %757 = vmatpush.msrb.mxu3 %v548_v61  ;;  %v843_v2 = vand.u32 4294901760, %v842_v55  ;;  %805 = vmatpush.msra.mxu0 %v1661_v8 }
  0x4e   : > { %759 = vmatpush.msrb.mxu3 %v550_v3  ;;  %v854_v3 = vsub.f32 %v1606_v41, %v853_v50  ;;  %844 = vmatpush.msra.mxu1 %v843_v2  ;;  %v902_v2 = vsub.f32 %v1709_v53, %v901_v62 }
  0x4f   : > { %807 = vmatpush.msra.mxu0 %v1666_v11 }
  0x50   : > { %v855_v19 = vand.u32 4294901760, %v854_v3  ;;  %850 = vmatpush.msra.mxu1 %v849_v9  ;;  %v768_v9 = vld [vmem:[%s1851_s5 + $0x10] sm:$0xff] }
  0x51   : > { %809 = vmatpush.msra.mxu0 %v1668_v12 }
  0x52   : > { %856 = vmatpush.msra.mxu1 %v855_v19  ;;  %v766_v19 = vld [vmem:[%s1851_s5] sm:$0xff] }
  0x53   : > { %811 = vmatpush.msra.mxu0 %v1692_v27 }
  0x9d   : > { %v508_v48 = vpop.f32.mrf.mxu1 }
  0xa0   : > { %v483_v39 = vpop.f32.mrf.mxu0 }
  0xa7   : > { %v352_v16 = vpop.f32.mrf.mxu2 }
  0xa8   : > { %v353_v18 = vadd.f32 %v352_v16, %v321_v15  ;;  %v1674_v15 = vsub.f32 %v774_v58, %v1656_v6  ;;  %v1677_v16 = vsub.f32 %v773_v59, %v1659_v7 }
  0xaa   : > { %v393_v17 = vpop.f32.mrf.mxu3  ;;  %v871_v21 = vand.u32 4294901760, %v1674_v15 }
  0xab   : > { %v394_v22 = vadd.f32 %v393_v17, %v353_v18  ;;  %v1681_v17 = vsub.f32 %v772_v60, %v1661_v8 }
  0xad   : > { %v883_v34 = vand.u32 4294901760, %v1681_v17 }
  0xaf   : > { %v423_v29 = vpop.f32.mrf.mxu2  ;;  %v884_v56 = vsub.f32 %v1681_v17, %v883_v34 }
  0xb0   : > { %v424_v35 = vadd.f32 %v423_v29, %v394_v22  ;;  %v877_v22 = vand.u32 4294901760, %v1677_v16  ;;  %v861_v29 = vand.u32 4294901760, %v860_v10  ;;  %v812_v10 = vand.u32 4294901760, %v768_v9 }
  0xb1   : > { %v885_v63 = vand.u32 4294901760, %v884_v56 }
  0xb2   : > { %v450_v30 = vpop.f32.mrf.mxu3  ;;  %862 = vmatpush.msra.mxu1 %v861_v29  ;;  %813 = vmatpush.msra.mxu0 %v812_v10  ;;  %v816_v29 = vand.u32 4294901760, %v766_v19 }
  0xb3   : > { %v451_v44 = vadd.f32 %v450_v30, %v424_v35  ;;  %v872_v30 = vsub.f32 %v1674_v15, %v871_v21  ;;  %v1700_v35 = vsub.f32 %v770_v1, %v1668_v12 }
  0xb5   : > { %v484_v52 = vadd.f32 %v483_v39, %v451_v44  ;;  %v867_v44 = vand.u32 4294901760, %v866_v20  ;;  %v873_v55 = vand.u32 4294901760, %v872_v30  ;;  %v895_v58 = vand.u32 4294901760, %v1700_v35 }
  0xb7   : > { %v509_v61 = vadd.f32 %v508_v48, %v484_v52  ;;  %v878_v48 = vsub.f32 %v1677_v16, %v877_v22  ;;  %v889_v52 = vand.u32 4294901760, %v1690_v26  ;;  %868 = vmatpush.msra.mxu1 %v867_v44  ;;  %v896_v0 = vsub.f32 %v1700_v35, %v895_v58 }
  0xb8   : > { %v918_v44 = vsub.f32 %v766_v19, %v816_v29 }
  0xb9   : > { %v511_v5 = vmax.f32 %v509_v61, 0.0  ;;  %v879_v60 = vand.u32 4294901760, %v878_v48  ;;  %v890_v61 = vsub.f32 %v1690_v26, %v889_v52  ;;  %874 = vmatpush.msra.mxu1 %v873_v55  ;;  %v897_v3 = vand.u32 4294901760, %v896_v0 }
  0xba   : > { %v919_v55 = vand.u32 4294901760, %v918_v44 }
  0xbb   : > { %v526_v14 = vsel %vm524_vm1, %v511_v5, 0  ;;  %880 = vmatpush.msra.mxu1 %v879_v60  ;;  %v891_v1 = vand.u32 4294901760, %v890_v61  ;;  %v903_v5 = vand.u32 4294901760, %v902_v2 }
  0xbc   : > { %v552_v18 = vand.u32 4294901760, %v526_v14 }
  0xbd   : > { %886 = vmatpush.msra.mxu1 %v885_v63 }
  0xbe   : > { %618 = vmatmul.f32.vlgmr.msra.gmra.mxu3 %v552_v18  ;;  %v553_v28 = vsub.f32 %v526_v14, %v552_v18  ;;  %v906_v14 = vsub.f32 %v768_v9, %v812_v10 }
  0xbf   : > { %983 = vmatpush.msra.mxu3 %v1568_v23  ;;  %892 = vmatpush.msra.mxu1 %v891_v1 }
  0xc0   : > { %656 = vmatmul.f32.vlgmr.msrb.gmra.mxu0 %v553_v28  ;;  %v554_v39 = vand.u32 4294901760, %v553_v28  ;;  %v907_v20 = vand.u32 4294901760, %v906_v14 }
  0xc1   : > { %985 = vmatpush.msra.mxu3 %v1570_v24  ;;  %898 = vmatpush.msra.mxu1 %v897_v3 }
  0xc2   : > { %v555_v54 = vsub.f32 %v553_v28, %v554_v39  ;;  %687 = vmatmul.f32.vlgmr.msrb.gmra.mxu1 %v554_v39  ;;  %v908_v30 = vsub.f32 %v906_v14, %v907_v20 }
  0xc3   : > { %987 = vmatpush.msra.mxu3 %v1572_v25  ;;  %904 = vmatpush.msra.mxu1 %v903_v5 }
  0xc4   : > { %v556_v59 = vand.u32 4294901760, %v555_v54  ;;  %v909_v48 = vand.u32 4294901760, %v908_v30 }
  0xc5   : > { %989 = vmatpush.msra.mxu3 %v1583_v31 }
  0xc6   : > { %557 = vmatmul.f32.vlgmr.msra.gmra.mxu2 %v556_v59  ;;  %761 = vmatmul.f32.vlgmr.msrb.gmra.mxu3 %v552_v18  ;;  %v920_v59 = vsub.f32 %v918_v44, %v919_v55 }
  0xc7   : > { %930 = vmatpush.msra.mxu2 %v1593_v36  ;;  %991 = vmatpush.msra.mxu3 %v1585_v32 }
  0xc8   : > { %910 = vmatpush.msra.mxu1 %v909_v48  ;;  %v921_v60 = vand.u32 4294901760, %v920_v59 }
  0xc9   : > { %933 = vmatpush.msra.mxu2 %v1596_v37  ;;  %993 = vmatpush.msra.mxu3 %v1587_v33 }
  0xcb   : > { %936 = vmatpush.msra.mxu2 %v1599_v38  ;;  %995 = vmatpush.msra.mxu3 %v1611_v43 }
  0xcd   : > { %939 = vmatpush.msra.mxu2 %v1603_v40  ;;  %997 = vmatpush.msra.mxu3 %v1656_v6 }
  0xce   : > { %732 = vmatmul.f32.vlgmr.msrb.gmra.mxu2 %v552_v18  ;;  %v814_v18 = vand.u32 4294901760, %v767_v13 }
  0xcf   : > { %942 = vmatpush.msra.mxu2 %v1606_v41  ;;  %999 = vmatpush.msra.mxu3 %v1659_v7 }
  0xd0   : > { %v912_v28 = vsub.f32 %v767_v13, %v814_v18  ;;  %815 = vmatpush.msra.mxu0 %v814_v18 }
  0xd1   : > { %945 = vmatpush.msra.mxu2 %v1609_v42  ;;  %1001 = vmatpush.msra.mxu3 %v1661_v8 }
  0xd2   : > { %v913_v39 = vand.u32 4294901760, %v912_v28  ;;  %817 = vmatpush.msra.mxu0 %v816_v29 }
  0xd3   : > { %948 = vmatpush.msra.mxu2 %v1620_v51  ;;  %1003 = vmatpush.msra.mxu3 %v1666_v11 }
  0xd4   : > { %1024 = vmatpush.msrb.mxu0 %v829_v45  ;;  %v914_v54 = vsub.f32 %v912_v28, %v913_v39 }
  0xd5   : > { %951 = vmatpush.msra.mxu2 %v1674_v15  ;;  %1005 = vmatpush.msra.mxu3 %v1668_v12 }
  0xd6   : > { %1028 = vmatpush.msrb.mxu0 %v835_v46  ;;  %v915_v56 = vand.u32 4294901760, %v914_v54 }
  0xd7   : > { %954 = vmatpush.msra.mxu2 %v1677_v16  ;;  %1007 = vmatpush.msra.mxu3 %v1692_v27 }
  0xd8   : > { %1032 = vmatpush.msrb.mxu0 %v841_v47  ;;  %916 = vmatpush.msra.mxu1 %v915_v56 }
  0xd9   : > { %957 = vmatpush.msra.mxu2 %v1681_v17  ;;  %1009 = vmatpush.msra.mxu3 %v812_v10 }
  0xda   : > { %1036 = vmatpush.msrb.mxu0 %v847_v49  ;;  %922 = vmatpush.msra.mxu1 %v921_v60 }
  0xdb   : > { %960 = vmatpush.msra.mxu2 %v1690_v26  ;;  %1011 = vmatpush.msra.mxu3 %v814_v18 }
  0xdc   : > { %1091 = vmatpush.msrb.mxu1 %v1568_v23  ;;  %1040 = vmatpush.msrb.mxu0 %v853_v50  ;;  %v1298_v23 = vld [vmem:[%s1850_s4] ss:$0 sm:$0xff] }
  0xdd   : > { %963 = vmatpush.msra.mxu2 %v1700_v35  ;;  %1013 = vmatpush.msra.mxu3 %v816_v29 }
  0xde   : > { %1093 = vmatpush.msrb.mxu1 %v1570_v24  ;;  %1044 = vmatpush.msrb.mxu0 %v859_v57  ;;  %v1299_v57 = vld [vmem:[%s1852_s6] ss:$0 sm:$0xff] }
  0xdf   : > { %966 = vmatpush.msra.mxu2 %v1709_v53 }
  0xe0   : > { %1095 = vmatpush.msrb.mxu1 %v1572_v25  ;;  %1048 = vmatpush.msrb.mxu0 %v865_v4 }
  0xe1   : > { %969 = vmatpush.msra.mxu2 %v906_v14 }
  0xe2   : > { %1097 = vmatpush.msrb.mxu1 %v1583_v31  ;;  %1052 = vmatpush.msrb.mxu0 %v871_v21 }
  0xe3   : > { %972 = vmatpush.msra.mxu2 %v912_v28 }
  0xe4   : > { %1099 = vmatpush.msrb.mxu1 %v1585_v32  ;;  %1056 = vmatpush.msrb.mxu0 %v877_v22 }
  0xe5   : > { %975 = vmatpush.msra.mxu2 %v918_v44 }
  0xe6   : > { %1101 = vmatpush.msrb.mxu1 %v1587_v33  ;;  %1060 = vmatpush.msrb.mxu0 %v883_v34 }
  0xe8   : > { %1103 = vmatpush.msrb.mxu1 %v1611_v43  ;;  %1064 = vmatpush.msrb.mxu0 %v889_v52 }
  0xea   : > { %1105 = vmatpush.msrb.mxu1 %v1656_v6  ;;  %1068 = vmatpush.msrb.mxu0 %v895_v58 }
  0xec   : > { %1107 = vmatpush.msrb.mxu1 %v1659_v7  ;;  %1072 = vmatpush.msrb.mxu0 %v901_v62 }
  0xee   : > { %1109 = vmatpush.msrb.mxu1 %v1661_v8  ;;  %1076 = vmatpush.msrb.mxu0 %v907_v20 }
  0xf0   : > { %1111 = vmatpush.msrb.mxu1 %v1666_v11  ;;  %1080 = vmatpush.msrb.mxu0 %v913_v39 }
  0xf2   : > { %1113 = vmatpush.msrb.mxu1 %v1668_v12  ;;  %1084 = vmatpush.msrb.mxu0 %v919_v55 }
  0xf4   : > { %1115 = vmatpush.msrb.mxu1 %v1692_v27 }
  0xf6   : > { %1117 = vmatpush.msrb.mxu1 %v812_v10 }
  0xf8   : > { %1119 = vmatpush.msrb.mxu1 %v814_v18 }
  0xfa   : > { %1121 = vmatpush.msrb.mxu1 %v816_v29 }
 0x13d   : > { %v657_v33 = vpop.f32.mrf.mxu0 }
 0x13f   : > { %v688_v37 = vpop.f32.mrf.mxu1 }
 0x141   : > { %v619_v24 = vpop.f32.mrf.mxu3 }
 0x149   : > { %v558_v25 = vpop.f32.mrf.mxu2  ;;  %v762_v42 = vpop.f32.mrf.mxu3 }
 0x14a   : > { %v559_v31 = vadd.f32 %v1298_v23, %v558_v25 }
 0x14c   : > { %v620_v32 = vadd.f32 %v619_v24, %v559_v31 }
 0x14e   : > { %v658_v36 = vadd.f32 %v657_v33, %v620_v32 }
 0x150   : > { %v689_v38 = vadd.f32 %v688_v37, %v658_v36 }
 0x151   : > { %v733_v40 = vpop.f32.mrf.mxu2 }
 0x152   : > { %v734_v41 = vadd.f32 %v733_v40, %v689_v38 }
 0x154   : > { %v763_v43 = vadd.f32 %v762_v42, %v734_v41 }
 0x156   : > { %v765_v45 = vmax.f32 %v763_v43, 0.0 }
 0x158   : > { %v818_v46 = vand.u32 4294901760, %v765_v45 }
 0x15a   : > { %v819_v47 = vsub.f32 %v765_v45, %v818_v46  ;;  %924 = vmatmul.f32.vlgmr.msra.gmra.mxu1 %v818_v46 }
 0x15c   : > { %978 = vmatmul.f32.vlgmr.msra.gmra.mxu2 %v819_v47  ;;  %v820_v49 = vand.u32 4294901760, %v819_v47 }
 0x15e   : > { %1017 = vmatmul.f32.vlgmr.msra.gmra.mxu3 %v820_v49  ;;  %v821_v50 = vsub.f32 %v819_v47, %v820_v49 }
 0x160   : > { %v822_v51 = vand.u32 4294901760, %v821_v50 }
 0x162   : > { %823 = vmatmul.f32.vlgmr.msra.gmra.mxu0 %v822_v51  ;;  %1123 = vmatmul.f32.vlgmr.msrb.gmra.mxu1 %v818_v46 }
 0x16a   : > { %1086 = vmatmul.f32.vlgmr.msrb.gmra.mxu0 %v818_v46 }
 0x1d7   : > { %v925_v4 = vpop.f32.mrf.mxu1 }
 0x1df   : > { %v824_v6 = vpop.f32.mrf.mxu0  ;;  %v979_v11 = vpop.f32.mrf.mxu2 }
 0x1e0   : > { %v825_v7 = vadd.f32 %v1299_v57, %v824_v6  ;;  %v1124_v22 = vpop.f32.mrf.mxu1 }
 0x1e1   : > { %v1018_v15 = vpop.f32.mrf.mxu3 }
 0x1e2   : > { %v926_v8 = vadd.f32 %v925_v4, %v825_v7 }
 0x1e4   : > { %v980_v12 = vadd.f32 %v979_v11, %v926_v8 }
 0x1e6   : > { %v1019_v16 = vadd.f32 %v1018_v15, %v980_v12 }
 0x1e7   : > { %v1087_v17 = vpop.f32.mrf.mxu0 }
 0x1e8   : > { %v1088_v21 = vadd.f32 %v1087_v17, %v1019_v16 }
 0x1ea   : > { %v1125_v26 = vadd.f32 %v1124_v22, %v1088_v21 }
 0x1ec   : > { %1127 = vst.msk [vmem:[%s304_s23] sm:$0xff] %vm322_vm0, %v1125_v26 }
 0x1ed   : > { %1327 = shalt.err (!%p1324_p5)
}
 0x1ee   : > { %1243 = dma.vmem_to_hbm [thread:$0]  (%p1460_p4), %s1143_s30, 128, %s1145_s8, %s1129_s27  }
 0x1ef PF: > { %p1249_p6 = scmp.ge.s32.totalorder %s1378_s29, 2  ;;  %s1156_s17 = sand.u32 1, %s1358_s24  }
 0x1f0   : > { %s1157_s21 = scalar_lea.sflag [#allocation3], %s1156_s17 }
 0x1f1   : > { %p1246_p7 = pnand %p1249_p6, %p1467_p8 }
 0x1f3   : > { %p1247_p9 = pneg %p1246_p7 }
 0x1f5   : > { %1353 = dma.done.wait (%p1247_p9), %s1157_s21, 128  }
 0x1f6   : > { %1355 = vsyncadd (%p1247_p9), %s1157_s21, 4294967168  ;;  %s20_s29 = sadd.s32 1, %s1378_s29   ;;  %s1856_s24 = smov %s1362_s25 }
 0x1f7   : > { %p17_p10 = scmp.ge.s32.totalorder %s20_s29, 4   ;;  %s1857_s25 = smov %s1366_s26 }
 0x1f8   : > { %s1858_s26 = smov %s1473_s14  ;;  %s1859_s27 = smov %s1374_s28 }
 0x1f9   : > { %s1860_s28 = smov %s1862_s9  ;;  %19 = sbr.rel (!%p17_p10) target bundleno = 4 (0x4), region = 86 }
 0x1fe   :  { %1163 = vsyncpa [#allocation3], 1 }
 0x1ff   :  { %1165 = vsyncpa [#allocation3 + $0x1], 1 }

</bundles_post_ra>
